<compile_context>
chip_gen: v5e
topology: v5e:2x2
jax: 0.10.0
libtpu: 0.0.40
codegen_flags: <defaults>
</compile_context>

<pallas_src>
import jax
import jax.numpy as jnp
from jax.experimental import pallas as pl
from jax.experimental.pallas import tpu as pltpu

# ----------------------------- config ---------------------------------------
N, C_IN, H, W = 2, 4, 64, 64
C_SEG = 2                      # background / foreground logits
V_DIM = 4                      # vertex-field channels
C_OUT = C_SEG + V_DIM
HW = H * W
LANES = 128
ROWS_PER_N = HW // LANES       # pixel rows (of 128 lanes) per sample
TILE_ROWS = 8                  # pixel rows per grid step; raise to 512-1024 at real PVNet sizes
STAT_ROWS = 8                  # packed stats tile rows (>= 2*N + 2)

assert HW % LANES == 0
assert ROWS_PER_N % TILE_ROWS == 0
assert 2 * N + 2 <= STAT_ROWS
N_TILES = ROWS_PER_N // TILE_ROWS


# -------------------------- fused forward kernel -----------------------------
def fused_kernel(w_ref, b_ref, x_ref, mask_ref, vgt_ref, vw_ref,
                 seg_ref, ver_ref, stats_ref,
                 ce_acc, il_acc, vw_acc, pred_acc, gt_acc, tp_acc):
    n = pl.program_id(0)                 # sample index
    t = pl.program_id(1)                 # pixel-tile index within the sample
    n_last = pl.num_programs(0) - 1
    t_last = pl.num_programs(1) - 1

    # ---- init per-sample accumulators at the first tile of each sample ------
    @pl.when(t == 0)
    def _():
        ce_acc[...] = jnp.zeros_like(ce_acc)
        il_acc[...] = jnp.zeros_like(il_acc)
        vw_acc[...] = jnp.zeros_like(vw_acc)

    # ---- init global accumulators + stats tile at the very first step -------
    @pl.when((n == 0) & (t == 0))
    def _():
        pred_acc[...] = jnp.zeros_like(pred_acc)
        gt_acc[...] = jnp.zeros_like(gt_acc)
        tp_acc[...] = jnp.zeros_like(tp_acc)
        stats_ref[...] = jnp.zeros_like(stats_ref)

    # ---- the "net": 1x1 conv as unrolled VPU FMA chains (SMEM scalar weights)
    xs = [x_ref[0, ci] for ci in range(C_IN)]        # C_IN x (TILE_ROWS, 128)

    def conv_channel(co):
        acc = xs[0] * w_ref[0, co] + b_ref[co]
        for ci in range(1, C_IN):
            acc = acc + xs[ci] * w_ref[ci, co]
        return acc

    # segmentation logits (kept live for CE / argmax)
    l0 = conv_channel(0)
    l1 = conv_channel(1)
    seg_ref[0, 0] = l0                               # full unmasked (8,128) stores
    seg_ref[0, 1] = l1

    # vertex channels: conv fused with smooth-L1 so only one channel is live at a time
    vw = vw_ref[0]                                   # (TILE_ROWS, 128)
    il_sum = jnp.zeros_like(vw)
    for j in range(V_DIM):
        vch = conv_channel(C_SEG + j)
        ver_ref[0, j] = vch
        diff = vw * (vch - vgt_ref[0, j])
        ad = jnp.abs(diff)
        il_sum = il_sum + jnp.where(ad < 1.0, 0.5 * diff * diff, ad - 0.5)

    fg = mask_ref[0] == 1.0                          # (TILE_ROWS, 128) bool
    gt_fg = fg.astype(jnp.float32)
    pred_fg = (l1 > l0).astype(jnp.float32)          # argmax w/ tie -> class 0

    # 2-class CrossEntropy: lse = max + log(1 + exp(-|l1 - l0|))  (one EUP exp)
    mx = jnp.maximum(l0, l1)
    ce = mx + jnp.log(1.0 + jnp.exp(-jnp.abs(l1 - l0))) - jnp.where(fg, l1, l0)

    # ---- elementwise accumulation (VALU only; XLU reduces deferred to finalize)
    ce_acc[...] += ce
    il_acc[...] += il_sum
    vw_acc[...] += vw
    pred_acc[...] += pred_fg
    gt_acc[...] += gt_fg
    tp_acc[...] += pred_fg * gt_fg

    def total(v):                                    # (TILE_ROWS,128) -> (1,1)
        return jnp.sum(jnp.sum(v, axis=1, keepdims=True), axis=0, keepdims=True)

    rows = jax.lax.broadcasted_iota(jnp.int32, (STAT_ROWS, LANES), 0)

    # ---- finalize per-sample losses at the last pixel tile of sample n ------
    @pl.when(t == t_last)
    def _():
        loss_seg = total(ce_acc[...]) * (1.0 / HW)
        loss_vertex = total(il_acc[...]) / (V_DIM * total(vw_acc[...]) + 1e-3)
        stats_ref[...] += (jnp.where(rows == n, loss_seg, 0.0)
                           + jnp.where(rows == N + n, loss_vertex, 0.0))

    # ---- finalize precision / recall at the very last grid step -------------
    @pl.when((n == n_last) & (t == t_last))
    def _():
        tp = total(tp_acc[...])
        sp = total(pred_acc[...])                    # tp + fp
        sg = total(gt_acc[...])                      # tp + fn
        precision = tp / (sp + 1e-6)
        recall = tp / (sg + 1e-6)
        stats_ref[...] += (jnp.where(rows == 2 * N, precision, 0.0)
                           + jnp.where(rows == 2 * N + 1, recall, 0.0))


def fused_forward(w, b1d, x4, m3, vgt4, vw3):
    n, _, rows, _ = x4.shape
    n_tiles = rows // TILE_ROWS
    smem = pl.BlockSpec(memory_space=pltpu.MemorySpace.SMEM)

    return pl.pallas_call(
        fused_kernel,
        grid=(n, n_tiles),
        in_specs=[
            smem,                                                            # w  (C_IN, C_OUT)
            smem,                                                            # b  (C_OUT,)
            pl.BlockSpec((1, C_IN, TILE_ROWS, LANES), lambda ni, ti: (ni, 0, ti, 0)),   # image
            pl.BlockSpec((1, TILE_ROWS, LANES), lambda ni, ti: (ni, ti, 0)),            # mask
            pl.BlockSpec((1, V_DIM, TILE_ROWS, LANES), lambda ni, ti: (ni, 0, ti, 0)),  # vertex gt
            pl.BlockSpec((1, TILE_ROWS, LANES), lambda ni, ti: (ni, ti, 0)),            # vertex wts
        ],
        out_specs=(
            pl.BlockSpec((1, C_SEG, TILE_ROWS, LANES), lambda ni, ti: (ni, 0, ti, 0)),  # seg logits
            pl.BlockSpec((1, V_DIM, TILE_ROWS, LANES), lambda ni, ti: (ni, 0, ti, 0)),  # vertex field
            pl.BlockSpec((STAT_ROWS, LANES), lambda ni, ti: (0, 0)),                    # packed stats
        ),
        out_shape=(
            jax.ShapeDtypeStruct((n, C_SEG, rows, LANES), jnp.float32),
            jax.ShapeDtypeStruct((n, V_DIM, rows, LANES), jnp.float32),
            jax.ShapeDtypeStruct((STAT_ROWS, LANES), jnp.float32),
        ),
        scratch_shapes=[pltpu.VMEM((TILE_ROWS, LANES), jnp.float32)] * 6,
        compiler_params=pltpu.CompilerParams(
            # Both axes "arbitrary": the stats output and global tp/pred/gt scratch
            # accumulate across both grid axes. (See v7x dual-TC TODO at top.)
            dimension_semantics=("arbitrary", "arbitrary"),
            vmem_limit_bytes=32 * 1024 * 1024,
        ),
    )(w, b1d, x4, m3, vgt4, vw3)


# ------------------------------ wrapper ---------------------------------------
def net_wrapper_forward(image, mask, vertex, vertex_weights, w, b):
    """image:(N,Cin,H,W) mask:(N,H,W) vertex:(N,V,H,W) vertex_weights:(N,1,H,W)."""
    n, cin, h, wd = image.shape
    hw = h * wd
    rows = hw // LANES
    # All pure reshapes of NCHW (no transpose): HW splits onto (sublane, lane) densely.
    x4 = image.reshape(n, cin, rows, LANES)
    m3 = mask.reshape(n, rows, LANES).astype(jnp.float32)
    vgt4 = vertex.reshape(n, V_DIM, rows, LANES)
    vw3 = vertex_weights.reshape(n, rows, LANES)
    b1d = b.reshape(-1)

    seg4, ver4, stats = fused_forward(w, b1d, x4, m3, vgt4, vw3)

    seg_pred = seg4.reshape(n, C_SEG, h, wd)         # NCHW, like torch
    vertex_pred = ver4.reshape(n, V_DIM, h, wd)      # NCHW, like torch
    loss_seg = stats[0:n, 0]
    loss_vertex = stats[n:2 * n, 0]
    precision = stats[2 * n, 0]
    recall = stats[2 * n + 1, 0]
    return seg_pred, vertex_pred, loss_seg, loss_vertex, precision, recall


# --------------------------- pure-JAX reference --------------------------------
def reference_forward(image, mask, vertex, vertex_weights, w, b):
    n, cin, h, wd = image.shape
    x = jnp.transpose(image, (0, 2, 3, 1)).reshape(-1, cin)
    y = (jnp.matmul(x, w, precision=jax.lax.Precision.HIGHEST) + b).reshape(n, h, wd, C_OUT)
    seg_nhwc, ver_nhwc = y[..., :C_SEG], y[..., C_SEG:]
    seg_pred = jnp.transpose(seg_nhwc, (0, 3, 1, 2))
    vertex_pred = jnp.transpose(ver_nhwc, (0, 3, 1, 2))

    logits = seg_nhwc.reshape(n, h * wd, C_SEG)
    logp = jax.nn.log_softmax(logits, axis=-1)
    m = mask.reshape(n, h * wd).astype(jnp.int32)
    ce = -jnp.take_along_axis(logp, m[..., None], axis=-1)[..., 0]
    loss_seg = ce.mean(axis=1)

    diff = vertex_weights * (vertex_pred - vertex)
    ad = jnp.abs(diff)
    sgn = (ad < 1.0).astype(jnp.float32)
    il = diff * diff * 0.5 * sgn + (ad - 0.5) * (1.0 - sgn)
    num = il.reshape(n, -1).sum(axis=1)
    den = V_DIM * vertex_weights.reshape(n, -1).sum(axis=1) + 1e-3
    loss_vertex = num / den

    pred = jnp.argmax(seg_pred, axis=1)
    tp = jnp.sum(((pred == 1) & (mask == 1)).astype(jnp.float32))
    fp = jnp.sum(((pred == 1) & (mask != 1)).astype(jnp.float32))
    fn = jnp.sum(((pred != 1) & (mask == 1)).astype(jnp.float32))
    precision = tp / (tp + fp + 1e-6)
    recall = tp / (tp + fn + 1e-6)
    return (seg_pred, vertex_pred, loss_seg, loss_vertex, precision, recall)


# --------------------------------- main ----------------------------------------
if __name__ == "__main__":
    key = jax.random.PRNGKey(0)
    k_img, k_mask, k_ver, k_w, k_b = jax.random.split(key, 5)

    image = jax.random.normal(k_img, (N, C_IN, H, W), jnp.float32)
    mask = jax.random.bernoulli(k_mask, 0.4, (N, H, W)).astype(jnp.int32)
    vertex = jax.random.normal(k_ver, (N, V_DIM, H, W), jnp.float32)
    vertex_weights = mask[:, None, :, :].astype(jnp.float32)       # (N,1,H,W)

    # deterministic synthetic "net" parameters (1x1 conv: C_IN -> C_OUT)
    w = jax.random.normal(k_w, (C_IN, C_OUT), jnp.float32) * 0.5
    b = jax.random.normal(k_b, (1, C_OUT), jnp.float32) * 0.1

    outs = jax.jit(net_wrapper_forward)(image, mask, vertex, vertex_weights, w, b)
    outs = jax.block_until_ready(outs)

    refs = reference_forward(image, mask, vertex, vertex_weights, w, b)
    names = ["seg_pred", "vertex_pred", "loss_seg", "loss_vertex",
             "precision", "recall"]
    for name, o, r in zip(names, outs, refs):
        r = jnp.asarray(r)
        assert o.shape == r.shape, (name, o.shape, r.shape)
        assert jnp.allclose(o, r, rtol=1e-3, atol=1e-3), (name, o, r)

    print("KERNEL_OK")
</pallas_src>

<mosaic_0001>
module attributes {stable_mosaic.version = 11 : i64} {
  func.func @fused_kernel(%arg0: i32, %arg1: i32, %arg2: memref<4x6xf32, #tpu.memory_space<smem>>, %arg3: memref<6xf32, #tpu.memory_space<smem>>, %arg4: memref<1x4x8x128xf32, #tpu.memory_space<vmem>>, %arg5: memref<1x8x128xf32, #tpu.memory_space<vmem>>, %arg6: memref<1x4x8x128xf32, #tpu.memory_space<vmem>>, %arg7: memref<1x8x128xf32, #tpu.memory_space<vmem>>, %arg8: memref<1x2x8x128xf32, #tpu.memory_space<vmem>>, %arg9: memref<1x4x8x128xf32, #tpu.memory_space<vmem>>, %arg10: memref<8x128xf32, #tpu.memory_space<vmem>>, %arg11: memref<8x128xf32, #tpu.memory_space<vmem>>, %arg12: memref<8x128xf32, #tpu.memory_space<vmem>>, %arg13: memref<8x128xf32, #tpu.memory_space<vmem>>, %arg14: memref<8x128xf32, #tpu.memory_space<vmem>>, %arg15: memref<8x128xf32, #tpu.memory_space<vmem>>, %arg16: memref<8x128xf32, #tpu.memory_space<vmem>>) attributes {dimension_semantics = [#tpu.dimension_semantics<arbitrary>, #tpu.dimension_semantics<arbitrary>], iteration_bounds = array<i64: 2, 4>, scalar_prefetch = 0 : i64, scratch_operands = 6 : i64, tpu.core_type = #tpu.core_type<tc>, window_params = [{transform_indices = @transform_0, window_bounds = array<i64: 4, 6>}, {transform_indices = @transform_1, window_bounds = array<i64: 6>}, {transform_indices = @transform_2, window_bounds = array<i64: 1, 4, 8, 128>}, {transform_indices = @transform_3, window_bounds = array<i64: 1, 8, 128>}, {transform_indices = @transform_4, window_bounds = array<i64: 1, 4, 8, 128>}, {transform_indices = @transform_5, window_bounds = array<i64: 1, 8, 128>}, {transform_indices = @transform_6, window_bounds = array<i64: 1, 2, 8, 128>}, {transform_indices = @transform_7, window_bounds = array<i64: 1, 4, 8, 128>}, {pipeline_mode = #tpu.pipeline_mode<synchronous>, transform_indices = @transform_8, window_bounds = array<i64: 8, 128>}]} {
    %c0_i32 = arith.constant 0 : i32
    %0 = arith.cmpi eq, %arg1, %c0_i32 : i32
    %1 = arith.extui %0 : i1 to i32
    %c0_i32_0 = arith.constant 0 : i32
    %2 = arith.cmpi ne, %1, %c0_i32_0 : i32
    scf.if %2 {
      %cst_156 = arith.constant 0.000000e+00 : f32
      %250 = vector.broadcast %cst_156 : f32 to vector<8x128xf32>
      %c0_157 = arith.constant 0 : index
      %c0_158 = arith.constant 0 : index
      %251 = vector.load %arg11[%c0_157, %c0_158] : memref<8x128xf32, #tpu.memory_space<vmem>>, vector<8x128xf32>
      tpu.vector_store %arg11[%c0_157, %c0_158], %250 {strides = array<i32>} : memref<8x128xf32, #tpu.memory_space<vmem>>, vector<8x128xf32>,
      %cst_159 = arith.constant 0.000000e+00 : f32
      %252 = vector.broadcast %cst_159 : f32 to vector<8x128xf32>
      %c0_160 = arith.constant 0 : index
      %c0_161 = arith.constant 0 : index
      %253 = vector.load %arg12[%c0_160, %c0_161] : memref<8x128xf32, #tpu.memory_space<vmem>>, vector<8x128xf32>
      tpu.vector_store %arg12[%c0_160, %c0_161], %252 {strides = array<i32>} : memref<8x128xf32, #tpu.memory_space<vmem>>, vector<8x128xf32>,
      %cst_162 = arith.constant 0.000000e+00 : f32
      %254 = vector.broadcast %cst_162 : f32 to vector<8x128xf32>
      %c0_163 = arith.constant 0 : index
      %c0_164 = arith.constant 0 : index
      %255 = vector.load %arg13[%c0_163, %c0_164] : memref<8x128xf32, #tpu.memory_space<vmem>>, vector<8x128xf32>
      tpu.vector_store %arg13[%c0_163, %c0_164], %254 {strides = array<i32>} : memref<8x128xf32, #tpu.memory_space<vmem>>, vector<8x128xf32>,
    } else {
    }
    %c0_i32_1 = arith.constant 0 : i32
    %3 = arith.cmpi eq, %arg0, %c0_i32_1 : i32
    %c0_i32_2 = arith.constant 0 : i32
    %4 = arith.cmpi eq, %arg1, %c0_i32_2 : i32
    %5 = arith.andi %3, %4 : i1
    %6 = arith.extui %5 : i1 to i32
    %c0_i32_3 = arith.constant 0 : i32
    %7 = arith.cmpi ne, %6, %c0_i32_3 : i32
    scf.if %7 {
      %cst_156 = arith.constant 0.000000e+00 : f32
      %250 = vector.broadcast %cst_156 : f32 to vector<8x128xf32>
      %c0_157 = arith.constant 0 : index
      %c0_158 = arith.constant 0 : index
      %251 = vector.load %arg14[%c0_157, %c0_158] : memref<8x128xf32, #tpu.memory_space<vmem>>, vector<8x128xf32>
      tpu.vector_store %arg14[%c0_157, %c0_158], %250 {strides = array<i32>} : memref<8x128xf32, #tpu.memory_space<vmem>>, vector<8x128xf32>,
      %cst_159 = arith.constant 0.000000e+00 : f32
      %252 = vector.broadcast %cst_159 : f32 to vector<8x128xf32>
      %c0_160 = arith.constant 0 : index
      %c0_161 = arith.constant 0 : index
      %253 = vector.load %arg15[%c0_160, %c0_161] : memref<8x128xf32, #tpu.memory_space<vmem>>, vector<8x128xf32>
      tpu.vector_store %arg15[%c0_160, %c0_161], %252 {strides = array<i32>} : memref<8x128xf32, #tpu.memory_space<vmem>>, vector<8x128xf32>,
      %cst_162 = arith.constant 0.000000e+00 : f32
      %254 = vector.broadcast %cst_162 : f32 to vector<8x128xf32>
      %c0_163 = arith.constant 0 : index
      %c0_164 = arith.constant 0 : index
      %255 = vector.load %arg16[%c0_163, %c0_164] : memref<8x128xf32, #tpu.memory_space<vmem>>, vector<8x128xf32>
      tpu.vector_store %arg16[%c0_163, %c0_164], %254 {strides = array<i32>} : memref<8x128xf32, #tpu.memory_space<vmem>>, vector<8x128xf32>,
      %cst_165 = arith.constant 0.000000e+00 : f32
      %256 = vector.broadcast %cst_165 : f32 to vector<8x128xf32>
      %c0_166 = arith.constant 0 : index
      %c0_167 = arith.constant 0 : index
      %257 = vector.load %arg10[%c0_166, %c0_167] : memref<8x128xf32, #tpu.memory_space<vmem>>, vector<8x128xf32>
      tpu.vector_store %arg10[%c0_166, %c0_167], %256 {strides = array<i32>} : memref<8x128xf32, #tpu.memory_space<vmem>>, vector<8x128xf32>,
    } else {
    }
    %c0 = arith.constant 0 : index
    %c0_4 = arith.constant 0 : index
    %c0_5 = arith.constant 0 : index
    %c0_6 = arith.constant 0 : index
    %8 = vector.load %arg4[%c0, %c0_4, %c0_5, %c0_6] : memref<1x4x8x128xf32, #tpu.memory_space<vmem>>, vector<1x1x8x128xf32>
    %9 = vector.shape_cast %8 : vector<1x1x8x128xf32> to vector<8x128xf32>
    %c0_7 = arith.constant 0 : index
    %c1 = arith.constant 1 : index
    %c0_8 = arith.constant 0 : index
    %c0_9 = arith.constant 0 : index
    %10 = vector.load %arg4[%c0_7, %c1, %c0_8, %c0_9] : memref<1x4x8x128xf32, #tpu.memory_space<vmem>>, vector<1x1x8x128xf32>
    %11 = vector.shape_cast %10 : vector<1x1x8x128xf32> to vector<8x128xf32>
    %c0_10 = arith.constant 0 : index
    %c2 = arith.constant 2 : index
    %c0_11 = arith.constant 0 : index
    %c0_12 = arith.constant 0 : index
    %12 = vector.load %arg4[%c0_10, %c2, %c0_11, %c0_12] : memref<1x4x8x128xf32, #tpu.memory_space<vmem>>, vector<1x1x8x128xf32>
    %13 = vector.shape_cast %12 : vector<1x1x8x128xf32> to vector<8x128xf32>
    %c0_13 = arith.constant 0 : index
    %c3 = arith.constant 3 : index
    %c0_14 = arith.constant 0 : index
    %c0_15 = arith.constant 0 : index
    %14 = vector.load %arg4[%c0_13, %c3, %c0_14, %c0_15] : memref<1x4x8x128xf32, #tpu.memory_space<vmem>>, vector<1x1x8x128xf32>
    %15 = vector.shape_cast %14 : vector<1x1x8x128xf32> to vector<8x128xf32>
    %c0_16 = arith.constant 0 : index
    %c0_17 = arith.constant 0 : index
    %16 = memref.load %arg2[%c0_16, %c0_17] : memref<4x6xf32, #tpu.memory_space<smem>>
    %17 = vector.broadcast %16 : f32 to vector<8x128xf32>
    %18 = arith.mulf %9, %17 : vector<8x128xf32>
    %c0_18 = arith.constant 0 : index
    %19 = memref.load %arg3[%c0_18] : memref<6xf32, #tpu.memory_space<smem>>
    %20 = vector.broadcast %19 : f32 to vector<8x128xf32>
    %21 = arith.addf %18, %20 : vector<8x128xf32>
    %c1_19 = arith.constant 1 : index
    %c0_20 = arith.constant 0 : index
    %22 = memref.load %arg2[%c1_19, %c0_20] : memref<4x6xf32, #tpu.memory_space<smem>>
    %23 = vector.broadcast %22 : f32 to vector<8x128xf32>
    %24 = arith.mulf %11, %23 : vector<8x128xf32>
    %25 = arith.addf %21, %24 : vector<8x128xf32>
    %c2_21 = arith.constant 2 : index
    %c0_22 = arith.constant 0 : index
    %26 = memref.load %arg2[%c2_21, %c0_22] : memref<4x6xf32, #tpu.memory_space<smem>>
    %27 = vector.broadcast %26 : f32 to vector<8x128xf32>
    %28 = arith.mulf %13, %27 : vector<8x128xf32>
    %29 = arith.addf %25, %28 : vector<8x128xf32>
    %c3_23 = arith.constant 3 : index
    %c0_24 = arith.constant 0 : index
    %30 = memref.load %arg2[%c3_23, %c0_24] : memref<4x6xf32, #tpu.memory_space<smem>>
    %31 = vector.broadcast %30 : f32 to vector<8x128xf32>
    %32 = arith.mulf %15, %31 : vector<8x128xf32>
    %33 = arith.addf %29, %32 : vector<8x128xf32>
    %c0_25 = arith.constant 0 : index
    %c1_26 = arith.constant 1 : index
    %34 = memref.load %arg2[%c0_25, %c1_26] : memref<4x6xf32, #tpu.memory_space<smem>>
    %35 = vector.broadcast %34 : f32 to vector<8x128xf32>
    %36 = arith.mulf %9, %35 : vector<8x128xf32>
    %c1_27 = arith.constant 1 : index
    %37 = memref.load %arg3[%c1_27] : memref<6xf32, #tpu.memory_space<smem>>
    %38 = vector.broadcast %37 : f32 to vector<8x128xf32>
    %39 = arith.addf %36, %38 : vector<8x128xf32>
    %c1_28 = arith.constant 1 : index
    %c1_29 = arith.constant 1 : index
    %40 = memref.load %arg2[%c1_28, %c1_29] : memref<4x6xf32, #tpu.memory_space<smem>>
    %41 = vector.broadcast %40 : f32 to vector<8x128xf32>
    %42 = arith.mulf %11, %41 : vector<8x128xf32>
    %43 = arith.addf %39, %42 : vector<8x128xf32>
    %c2_30 = arith.constant 2 : index
    %c1_31 = arith.constant 1 : index
    %44 = memref.load %arg2[%c2_30, %c1_31] : memref<4x6xf32, #tpu.memory_space<smem>>
    %45 = vector.broadcast %44 : f32 to vector<8x128xf32>
    %46 = arith.mulf %13, %45 : vector<8x128xf32>
    %47 = arith.addf %43, %46 : vector<8x128xf32>
    %c3_32 = arith.constant 3 : index
    %c1_33 = arith.constant 1 : index
    %48 = memref.load %arg2[%c3_32, %c1_33] : memref<4x6xf32, #tpu.memory_space<smem>>
    %49 = vector.broadcast %48 : f32 to vector<8x128xf32>
    %50 = arith.mulf %15, %49 : vector<8x128xf32>
    %51 = arith.addf %47, %50 : vector<8x128xf32>
    %c0_34 = arith.constant 0 : index
    %c0_35 = arith.constant 0 : index
    %c0_36 = arith.constant 0 : index
    %c0_37 = arith.constant 0 : index
    %52 = vector.load %arg8[%c0_34, %c0_35, %c0_36, %c0_37] : memref<1x2x8x128xf32, #tpu.memory_space<vmem>>, vector<1x1x8x128xf32>
    %53 = vector.shape_cast %52 : vector<1x1x8x128xf32> to vector<8x128xf32>
    %54 = vector.shape_cast %33 : vector<8x128xf32> to vector<1x1x8x128xf32>
    tpu.vector_store %arg8[%c0_34, %c0_35, %c0_36, %c0_37], %54 {strides = array<i32>} : memref<1x2x8x128xf32, #tpu.memory_space<vmem>>, vector<1x1x8x128xf32>,
    %c0_38 = arith.constant 0 : index
    %c1_39 = arith.constant 1 : index
    %c0_40 = arith.constant 0 : index
    %c0_41 = arith.constant 0 : index
    %55 = vector.load %arg8[%c0_38, %c1_39, %c0_40, %c0_41] : memref<1x2x8x128xf32, #tpu.memory_space<vmem>>, vector<1x1x8x128xf32>
    %56 = vector.shape_cast %55 : vector<1x1x8x128xf32> to vector<8x128xf32>
    %57 = vector.shape_cast %51 : vector<8x128xf32> to vector<1x1x8x128xf32>
    tpu.vector_store %arg8[%c0_38, %c1_39, %c0_40, %c0_41], %57 {strides = array<i32>} : memref<1x2x8x128xf32, #tpu.memory_space<vmem>>, vector<1x1x8x128xf32>,
    %c0_42 = arith.constant 0 : index
    %c0_43 = arith.constant 0 : index
    %c0_44 = arith.constant 0 : index
    %58 = vector.load %arg7[%c0_42, %c0_43, %c0_44] : memref<1x8x128xf32, #tpu.memory_space<vmem>>, vector<1x8x128xf32>
    %59 = vector.shape_cast %58 : vector<1x8x128xf32> to vector<8x128xf32>
    %cst = arith.constant 0.000000e+00 : f32
    %60 = vector.broadcast %cst : f32 to vector<8x128xf32>
    %c0_45 = arith.constant 0 : index
    %c2_46 = arith.constant 2 : index
    %61 = memref.load %arg2[%c0_45, %c2_46] : memref<4x6xf32, #tpu.memory_space<smem>>
    %62 = vector.broadcast %61 : f32 to vector<8x128xf32>
    %63 = arith.mulf %9, %62 : vector<8x128xf32>
    %c2_47 = arith.constant 2 : index
    %64 = memref.load %arg3[%c2_47] : memref<6xf32, #tpu.memory_space<smem>>
    %65 = vector.broadcast %64 : f32 to vector<8x128xf32>
    %66 = arith.addf %63, %65 : vector<8x128xf32>
    %c1_48 = arith.constant 1 : index
    %c2_49 = arith.constant 2 : index
    %67 = memref.load %arg2[%c1_48, %c2_49] : memref<4x6xf32, #tpu.memory_space<smem>>
    %68 = vector.broadcast %67 : f32 to vector<8x128xf32>
    %69 = arith.mulf %11, %68 : vector<8x128xf32>
    %70 = arith.addf %66, %69 : vector<8x128xf32>
    %c2_50 = arith.constant 2 : index
    %c2_51 = arith.constant 2 : index
    %71 = memref.load %arg2[%c2_50, %c2_51] : memref<4x6xf32, #tpu.memory_space<smem>>
    %72 = vector.broadcast %71 : f32 to vector<8x128xf32>
    %73 = arith.mulf %13, %72 : vector<8x128xf32>
    %74 = arith.addf %70, %73 : vector<8x128xf32>
    %c3_52 = arith.constant 3 : index
    %c2_53 = arith.constant 2 : index
    %75 = memref.load %arg2[%c3_52, %c2_53] : memref<4x6xf32, #tpu.memory_space<smem>>
    %76 = vector.broadcast %75 : f32 to vector<8x128xf32>
    %77 = arith.mulf %15, %76 : vector<8x128xf32>
    %78 = arith.addf %74, %77 : vector<8x128xf32>
    %c0_54 = arith.constant 0 : index
    %c0_55 = arith.constant 0 : index
    %c0_56 = arith.constant 0 : index
    %c0_57 = arith.constant 0 : index
    %79 = vector.load %arg9[%c0_54, %c0_55, %c0_56, %c0_57] : memref<1x4x8x128xf32, #tpu.memory_space<vmem>>, vector<1x1x8x128xf32>
    %80 = vector.shape_cast %79 : vector<1x1x8x128xf32> to vector<8x128xf32>
    %81 = vector.shape_cast %78 : vector<8x128xf32> to vector<1x1x8x128xf32>
    tpu.vector_store %arg9[%c0_54, %c0_55, %c0_56, %c0_57], %81 {strides = array<i32>} : memref<1x4x8x128xf32, #tpu.memory_space<vmem>>, vector<1x1x8x128xf32>,
    %c0_58 = arith.constant 0 : index
    %c0_59 = arith.constant 0 : index
    %c0_60 = arith.constant 0 : index
    %c0_61 = arith.constant 0 : index
    %82 = vector.load %arg6[%c0_58, %c0_59, %c0_60, %c0_61] : memref<1x4x8x128xf32, #tpu.memory_space<vmem>>, vector<1x1x8x128xf32>
    %83 = vector.shape_cast %82 : vector<1x1x8x128xf32> to vector<8x128xf32>
    %84 = arith.subf %78, %83 : vector<8x128xf32>
    %85 = arith.mulf %59, %84 : vector<8x128xf32>
    %86 = math.absf %85 : vector<8x128xf32>
    %cst_62 = arith.constant 1.000000e+00 : f32
    %87 = vector.broadcast %cst_62 : f32 to vector<8x128xf32>
    %88 = arith.cmpf olt, %86, %87 : vector<8x128xf32>
    %cst_63 = arith.constant 5.000000e-01 : f32
    %89 = vector.broadcast %cst_63 : f32 to vector<8x128xf32>
    %90 = arith.mulf %89, %85 : vector<8x128xf32>
    %91 = arith.mulf %90, %85 : vector<8x128xf32>
    %cst_64 = arith.constant 5.000000e-01 : f32
    %92 = vector.broadcast %cst_64 : f32 to vector<8x128xf32>
    %93 = arith.subf %86, %92 : vector<8x128xf32>
    %94 = arith.select %88, %91, %93 : vector<8x128xi1>, vector<8x128xf32>
    %95 = arith.addf %60, %94 : vector<8x128xf32>
    %c0_65 = arith.constant 0 : index
    %c3_66 = arith.constant 3 : index
    %96 = memref.load %arg2[%c0_65, %c3_66] : memref<4x6xf32, #tpu.memory_space<smem>>
    %97 = vector.broadcast %96 : f32 to vector<8x128xf32>
    %98 = arith.mulf %9, %97 : vector<8x128xf32>
    %c3_67 = arith.constant 3 : index
    %99 = memref.load %arg3[%c3_67] : memref<6xf32, #tpu.memory_space<smem>>
    %100 = vector.broadcast %99 : f32 to vector<8x128xf32>
    %101 = arith.addf %98, %100 : vector<8x128xf32>
    %c1_68 = arith.constant 1 : index
    %c3_69 = arith.constant 3 : index
    %102 = memref.load %arg2[%c1_68, %c3_69] : memref<4x6xf32, #tpu.memory_space<smem>>
    %103 = vector.broadcast %102 : f32 to vector<8x128xf32>
    %104 = arith.mulf %11, %103 : vector<8x128xf32>
    %105 = arith.addf %101, %104 : vector<8x128xf32>
    %c2_70 = arith.constant 2 : index
    %c3_71 = arith.constant 3 : index
    %106 = memref.load %arg2[%c2_70, %c3_71] : memref<4x6xf32, #tpu.memory_space<smem>>
    %107 = vector.broadcast %106 : f32 to vector<8x128xf32>
    %108 = arith.mulf %13, %107 : vector<8x128xf32>
    %109 = arith.addf %105, %108 : vector<8x128xf32>
    %c3_72 = arith.constant 3 : index
    %c3_73 = arith.constant 3 : index
    %110 = memref.load %arg2[%c3_72, %c3_73] : memref<4x6xf32, #tpu.memory_space<smem>>
    %111 = vector.broadcast %110 : f32 to vector<8x128xf32>
    %112 = arith.mulf %15, %111 : vector<8x128xf32>
    %113 = arith.addf %109, %112 : vector<8x128xf32>
    %c0_74 = arith.constant 0 : index
    %c1_75 = arith.constant 1 : index
    %c0_76 = arith.constant 0 : index
    %c0_77 = arith.constant 0 : index
    %114 = vector.load %arg9[%c0_74, %c1_75, %c0_76, %c0_77] : memref<1x4x8x128xf32, #tpu.memory_space<vmem>>, vector<1x1x8x128xf32>
    %115 = vector.shape_cast %114 : vector<1x1x8x128xf32> to vector<8x128xf32>
    %116 = vector.shape_cast %113 : vector<8x128xf32> to vector<1x1x8x128xf32>
    tpu.vector_store %arg9[%c0_74, %c1_75, %c0_76, %c0_77], %116 {strides = array<i32>} : memref<1x4x8x128xf32, #tpu.memory_space<vmem>>, vector<1x1x8x128xf32>,
    %c0_78 = arith.constant 0 : index
    %c1_79 = arith.constant 1 : index
    %c0_80 = arith.constant 0 : index
    %c0_81 = arith.constant 0 : index
    %117 = vector.load %arg6[%c0_78, %c1_79, %c0_80, %c0_81] : memref<1x4x8x128xf32, #tpu.memory_space<vmem>>, vector<1x1x8x128xf32>
    %118 = vector.shape_cast %117 : vector<1x1x8x128xf32> to vector<8x128xf32>
    %119 = arith.subf %113, %118 : vector<8x128xf32>
    %120 = arith.mulf %59, %119 : vector<8x128xf32>
    %121 = math.absf %120 : vector<8x128xf32>
    %cst_82 = arith.constant 1.000000e+00 : f32
    %122 = vector.broadcast %cst_82 : f32 to vector<8x128xf32>
    %123 = arith.cmpf olt, %121, %122 : vector<8x128xf32>
    %cst_83 = arith.constant 5.000000e-01 : f32
    %124 = vector.broadcast %cst_83 : f32 to vector<8x128xf32>
    %125 = arith.mulf %124, %120 : vector<8x128xf32>
    %126 = arith.mulf %125, %120 : vector<8x128xf32>
    %cst_84 = arith.constant 5.000000e-01 : f32
    %127 = vector.broadcast %cst_84 : f32 to vector<8x128xf32>
    %128 = arith.subf %121, %127 : vector<8x128xf32>
    %129 = arith.select %123, %126, %128 : vector<8x128xi1>, vector<8x128xf32>
    %130 = arith.addf %95, %129 : vector<8x128xf32>
    %c0_85 = arith.constant 0 : index
    %c4 = arith.constant 4 : index
    %131 = memref.load %arg2[%c0_85, %c4] : memref<4x6xf32, #tpu.memory_space<smem>>
    %132 = vector.broadcast %131 : f32 to vector<8x128xf32>
    %133 = arith.mulf %9, %132 : vector<8x128xf32>
    %c4_86 = arith.constant 4 : index
    %134 = memref.load %arg3[%c4_86] : memref<6xf32, #tpu.memory_space<smem>>
    %135 = vector.broadcast %134 : f32 to vector<8x128xf32>
    %136 = arith.addf %133, %135 : vector<8x128xf32>
    %c1_87 = arith.constant 1 : index
    %c4_88 = arith.constant 4 : index
    %137 = memref.load %arg2[%c1_87, %c4_88] : memref<4x6xf32, #tpu.memory_space<smem>>
    %138 = vector.broadcast %137 : f32 to vector<8x128xf32>
    %139 = arith.mulf %11, %138 : vector<8x128xf32>
    %140 = arith.addf %136, %139 : vector<8x128xf32>
    %c2_89 = arith.constant 2 : index
    %c4_90 = arith.constant 4 : index
    %141 = memref.load %arg2[%c2_89, %c4_90] : memref<4x6xf32, #tpu.memory_space<smem>>
    %142 = vector.broadcast %141 : f32 to vector<8x128xf32>
    %143 = arith.mulf %13, %142 : vector<8x128xf32>
    %144 = arith.addf %140, %143 : vector<8x128xf32>
    %c3_91 = arith.constant 3 : index
    %c4_92 = arith.constant 4 : index
    %145 = memref.load %arg2[%c3_91, %c4_92] : memref<4x6xf32, #tpu.memory_space<smem>>
    %146 = vector.broadcast %145 : f32 to vector<8x128xf32>
    %147 = arith.mulf %15, %146 : vector<8x128xf32>
    %148 = arith.addf %144, %147 : vector<8x128xf32>
    %c0_93 = arith.constant 0 : index
    %c2_94 = arith.constant 2 : index
    %c0_95 = arith.constant 0 : index
    %c0_96 = arith.constant 0 : index
    %149 = vector.load %arg9[%c0_93, %c2_94, %c0_95, %c0_96] : memref<1x4x8x128xf32, #tpu.memory_space<vmem>>, vector<1x1x8x128xf32>
    %150 = vector.shape_cast %149 : vector<1x1x8x128xf32> to vector<8x128xf32>
    %151 = vector.shape_cast %148 : vector<8x128xf32> to vector<1x1x8x128xf32>
    tpu.vector_store %arg9[%c0_93, %c2_94, %c0_95, %c0_96], %151 {strides = array<i32>} : memref<1x4x8x128xf32, #tpu.memory_space<vmem>>, vector<1x1x8x128xf32>,
    %c0_97 = arith.constant 0 : index
    %c2_98 = arith.constant 2 : index
    %c0_99 = arith.constant 0 : index
    %c0_100 = arith.constant 0 : index
    %152 = vector.load %arg6[%c0_97, %c2_98, %c0_99, %c0_100] : memref<1x4x8x128xf32, #tpu.memory_space<vmem>>, vector<1x1x8x128xf32>
    %153 = vector.shape_cast %152 : vector<1x1x8x128xf32> to vector<8x128xf32>
    %154 = arith.subf %148, %153 : vector<8x128xf32>
    %155 = arith.mulf %59, %154 : vector<8x128xf32>
    %156 = math.absf %155 : vector<8x128xf32>
    %cst_101 = arith.constant 1.000000e+00 : f32
    %157 = vector.broadcast %cst_101 : f32 to vector<8x128xf32>
    %158 = arith.cmpf olt, %156, %157 : vector<8x128xf32>
    %cst_102 = arith.constant 5.000000e-01 : f32
    %159 = vector.broadcast %cst_102 : f32 to vector<8x128xf32>
    %160 = arith.mulf %159, %155 : vector<8x128xf32>
    %161 = arith.mulf %160, %155 : vector<8x128xf32>
    %cst_103 = arith.constant 5.000000e-01 : f32
    %162 = vector.broadcast %cst_103 : f32 to vector<8x128xf32>
    %163 = arith.subf %156, %162 : vector<8x128xf32>
    %164 = arith.select %158, %161, %163 : vector<8x128xi1>, vector<8x128xf32>
    %165 = arith.addf %130, %164 : vector<8x128xf32>
    %c0_104 = arith.constant 0 : index
    %c5 = arith.constant 5 : index
    %166 = memref.load %arg2[%c0_104, %c5] : memref<4x6xf32, #tpu.memory_space<smem>>
    %167 = vector.broadcast %166 : f32 to vector<8x128xf32>
    %168 = arith.mulf %9, %167 : vector<8x128xf32>
    %c5_105 = arith.constant 5 : index
    %169 = memref.load %arg3[%c5_105] : memref<6xf32, #tpu.memory_space<smem>>
    %170 = vector.broadcast %169 : f32 to vector<8x128xf32>
    %171 = arith.addf %168, %170 : vector<8x128xf32>
    %c1_106 = arith.constant 1 : index
    %c5_107 = arith.constant 5 : index
    %172 = memref.load %arg2[%c1_106, %c5_107] : memref<4x6xf32, #tpu.memory_space<smem>>
    %173 = vector.broadcast %172 : f32 to vector<8x128xf32>
    %174 = arith.mulf %11, %173 : vector<8x128xf32>
    %175 = arith.addf %171, %174 : vector<8x128xf32>
    %c2_108 = arith.constant 2 : index
    %c5_109 = arith.constant 5 : index
    %176 = memref.load %arg2[%c2_108, %c5_109] : memref<4x6xf32, #tpu.memory_space<smem>>
    %177 = vector.broadcast %176 : f32 to vector<8x128xf32>
    %178 = arith.mulf %13, %177 : vector<8x128xf32>
    %179 = arith.addf %175, %178 : vector<8x128xf32>
    %c3_110 = arith.constant 3 : index
    %c5_111 = arith.constant 5 : index
    %180 = memref.load %arg2[%c3_110, %c5_111] : memref<4x6xf32, #tpu.memory_space<smem>>
    %181 = vector.broadcast %180 : f32 to vector<8x128xf32>
    %182 = arith.mulf %15, %181 : vector<8x128xf32>
    %183 = arith.addf %179, %182 : vector<8x128xf32>
    %c0_112 = arith.constant 0 : index
    %c3_113 = arith.constant 3 : index
    %c0_114 = arith.constant 0 : index
    %c0_115 = arith.constant 0 : index
    %184 = vector.load %arg9[%c0_112, %c3_113, %c0_114, %c0_115] : memref<1x4x8x128xf32, #tpu.memory_space<vmem>>, vector<1x1x8x128xf32>
    %185 = vector.shape_cast %184 : vector<1x1x8x128xf32> to vector<8x128xf32>
    %186 = vector.shape_cast %183 : vector<8x128xf32> to vector<1x1x8x128xf32>
    tpu.vector_store %arg9[%c0_112, %c3_113, %c0_114, %c0_115], %186 {strides = array<i32>} : memref<1x4x8x128xf32, #tpu.memory_space<vmem>>, vector<1x1x8x128xf32>,
    %c0_116 = arith.constant 0 : index
    %c3_117 = arith.constant 3 : index
    %c0_118 = arith.constant 0 : index
    %c0_119 = arith.constant 0 : index
    %187 = vector.load %arg6[%c0_116, %c3_117, %c0_118, %c0_119] : memref<1x4x8x128xf32, #tpu.memory_space<vmem>>, vector<1x1x8x128xf32>
    %188 = vector.shape_cast %187 : vector<1x1x8x128xf32> to vector<8x128xf32>
    %189 = arith.subf %183, %188 : vector<8x128xf32>
    %190 = arith.mulf %59, %189 : vector<8x128xf32>
    %191 = math.absf %190 : vector<8x128xf32>
    %cst_120 = arith.constant 1.000000e+00 : f32
    %192 = vector.broadcast %cst_120 : f32 to vector<8x128xf32>
    %193 = arith.cmpf olt, %191, %192 : vector<8x128xf32>
    %cst_121 = arith.constant 5.000000e-01 : f32
    %194 = vector.broadcast %cst_121 : f32 to vector<8x128xf32>
    %195 = arith.mulf %194, %190 : vector<8x128xf32>
    %196 = arith.mulf %195, %190 : vector<8x128xf32>
    %cst_122 = arith.constant 5.000000e-01 : f32
    %197 = vector.broadcast %cst_122 : f32 to vector<8x128xf32>
    %198 = arith.subf %191, %197 : vector<8x128xf32>
    %199 = arith.select %193, %196, %198 : vector<8x128xi1>, vector<8x128xf32>
    %200 = arith.addf %165, %199 : vector<8x128xf32>
    %c0_123 = arith.constant 0 : index
    %c0_124 = arith.constant 0 : index
    %c0_125 = arith.constant 0 : index
    %201 = vector.load %arg5[%c0_123, %c0_124, %c0_125] : memref<1x8x128xf32, #tpu.memory_space<vmem>>, vector<1x8x128xf32>
    %202 = vector.shape_cast %201 : vector<1x8x128xf32> to vector<8x128xf32>
    %cst_126 = arith.constant 1.000000e+00 : f32
    %203 = vector.broadcast %cst_126 : f32 to vector<8x128xf32>
    %204 = arith.cmpf oeq, %202, %203 : vector<8x128xf32>
    %205 = arith.extui %204 : vector<8x128xi1> to vector<8x128xi32>
    %206 = arith.sitofp %205 : vector<8x128xi32> to vector<8x128xf32>
    %207 = arith.cmpf ogt, %51, %33 : vector<8x128xf32>
    %208 = arith.extui %207 : vector<8x128xi1> to vector<8x128xi32>
    %209 = arith.sitofp %208 : vector<8x128xi32> to vector<8x128xf32>
    %210 = arith.maximumf %33, %51 : vector<8x128xf32>
    %211 = arith.subf %51, %33 : vector<8x128xf32>
    %212 = math.absf %211 : vector<8x128xf32>
    %cst_127 = arith.constant 0.000000e+00 : f32
    %213 = vector.broadcast %cst_127 : f32 to vector<8x128xf32>
    %214 = arith.subf %213, %212 : vector<8x128xf32>
    %215 = math.exp %214 : vector<8x128xf32>
    %cst_128 = arith.constant 1.000000e+00 : f32
    %216 = vector.broadcast %cst_128 : f32 to vector<8x128xf32>
    %217 = arith.addf %216, %215 : vector<8x128xf32>
    %218 = math.log %217 : vector<8x128xf32>
    %219 = arith.addf %210, %218 : vector<8x128xf32>
    %220 = arith.select %204, %51, %33 : vector<8x128xi1>, vector<8x128xf32>
    %221 = arith.subf %219, %220 : vector<8x128xf32>
    %c0_129 = arith.constant 0 : index
    %c0_130 = arith.constant 0 : index
    %222 = vector.load %arg11[%c0_129, %c0_130] : memref<8x128xf32, #tpu.memory_space<vmem>>, vector<8x128xf32>
    %223 = arith.addf %222, %221 : vector<8x128xf32>
    %c0_131 = arith.constant 0 : index
    %c0_132 = arith.constant 0 : index
    %224 = vector.load %arg11[%c0_131, %c0_132] : memref<8x128xf32, #tpu.memory_space<vmem>>, vector<8x128xf32>
    tpu.vector_store %arg11[%c0_131, %c0_132], %223 {strides = array<i32>} : memref<8x128xf32, #tpu.memory_space<vmem>>, vector<8x128xf32>,
    %c0_133 = arith.constant 0 : index
    %c0_134 = arith.constant 0 : index
    %225 = vector.load %arg12[%c0_133, %c0_134] : memref<8x128xf32, #tpu.memory_space<vmem>>, vector<8x128xf32>
    %226 = arith.addf %225, %200 : vector<8x128xf32>
    %c0_135 = arith.constant 0 : index
    %c0_136 = arith.constant 0 : index
    %227 = vector.load %arg12[%c0_135, %c0_136] : memref<8x128xf32, #tpu.memory_space<vmem>>, vector<8x128xf32>
    tpu.vector_store %arg12[%c0_135, %c0_136], %226 {strides = array<i32>} : memref<8x128xf32, #tpu.memory_space<vmem>>, vector<8x128xf32>,
    %c0_137 = arith.constant 0 : index
    %c0_138 = arith.constant 0 : index
    %228 = vector.load %arg13[%c0_137, %c0_138] : memref<8x128xf32, #tpu.memory_space<vmem>>, vector<8x128xf32>
    %229 = arith.addf %228, %59 : vector<8x128xf32>
    %c0_139 = arith.constant 0 : index
    %c0_140 = arith.constant 0 : index
    %230 = vector.load %arg13[%c0_139, %c0_140] : memref<8x128xf32, #tpu.memory_space<vmem>>, vector<8x128xf32>
    tpu.vector_store %arg13[%c0_139, %c0_140], %229 {strides = array<i32>} : memref<8x128xf32, #tpu.memory_space<vmem>>, vector<8x128xf32>,
    %c0_141 = arith.constant 0 : index
    %c0_142 = arith.constant 0 : index
    %231 = vector.load %arg14[%c0_141, %c0_142] : memref<8x128xf32, #tpu.memory_space<vmem>>, vector<8x128xf32>
    %232 = arith.addf %231, %209 : vector<8x128xf32>
    %c0_143 = arith.constant 0 : index
    %c0_144 = arith.constant 0 : index
    %233 = vector.load %arg14[%c0_143, %c0_144] : memref<8x128xf32, #tpu.memory_space<vmem>>, vector<8x128xf32>
    tpu.vector_store %arg14[%c0_143, %c0_144], %232 {strides = array<i32>} : memref<8x128xf32, #tpu.memory_space<vmem>>, vector<8x128xf32>,
    %c0_145 = arith.constant 0 : index
    %c0_146 = arith.constant 0 : index
    %234 = vector.load %arg15[%c0_145, %c0_146] : memref<8x128xf32, #tpu.memory_space<vmem>>, vector<8x128xf32>
    %235 = arith.addf %234, %206 : vector<8x128xf32>
    %c0_147 = arith.constant 0 : index
    %c0_148 = arith.constant 0 : index
    %236 = vector.load %arg15[%c0_147, %c0_148] : memref<8x128xf32, #tpu.memory_space<vmem>>, vector<8x128xf32>
    tpu.vector_store %arg15[%c0_147, %c0_148], %235 {strides = array<i32>} : memref<8x128xf32, #tpu.memory_space<vmem>>, vector<8x128xf32>,
    %c0_149 = arith.constant 0 : index
    %c0_150 = arith.constant 0 : index
    %237 = vector.load %arg16[%c0_149, %c0_150] : memref<8x128xf32, #tpu.memory_space<vmem>>, vector<8x128xf32>
    %238 = arith.mulf %209, %206 : vector<8x128xf32>
    %239 = arith.addf %237, %238 : vector<8x128xf32>
    %c0_151 = arith.constant 0 : index
    %c0_152 = arith.constant 0 : index
    %240 = vector.load %arg16[%c0_151, %c0_152] : memref<8x128xf32, #tpu.memory_space<vmem>>, vector<8x128xf32>
    tpu.vector_store %arg16[%c0_151, %c0_152], %239 {strides = array<i32>} : memref<8x128xf32, #tpu.memory_space<vmem>>, vector<8x128xf32>,
    %241 = tpu.iota {dimensions = array<i32: 0>} : vector<8x128xi32>
    %c3_i32 = arith.constant 3 : i32
    %242 = arith.cmpi eq, %arg1, %c3_i32 : i32
    %243 = arith.extui %242 : i1 to i32
    %c0_i32_153 = arith.constant 0 : i32
    %244 = arith.cmpi ne, %243, %c0_i32_153 : i32
    scf.if %244 {
      %c0_156 = arith.constant 0 : index
      %c0_157 = arith.constant 0 : index
      %250 = vector.load %arg11[%c0_156, %c0_157] : memref<8x128xf32, #tpu.memory_space<vmem>>, vector<8x128xf32>
      %cst_158 = arith.constant dense<0.000000e+00> : vector<8xf32>
      %251 = vector.multi_reduction <add>, %250, %cst_158 [1] : vector<8x128xf32> to vector<8xf32>
      %252 = vector.shape_cast %251 : vector<8xf32> to vector<8x1xf32>
      %cst_159 = arith.constant dense<0.000000e+00> : vector<1xf32>
      %253 = vector.multi_reduction <add>, %252, %cst_159 [0] : vector<8x1xf32> to vector<1xf32>
      %254 = vector.shape_cast %253 : vector<1xf32> to vector<1x1xf32>
      %cst_160 = arith.constant 2.44140625E-4 : f32
      %255 = vector.broadcast %cst_160 : f32 to vector<1x1xf32>
      %256 = arith.mulf %254, %255 : vector<1x1xf32>
      %c0_161 = arith.constant 0 : index
      %c0_162 = arith.constant 0 : index
      %257 = vector.load %arg12[%c0_161, %c0_162] : memref<8x128xf32, #tpu.memory_space<vmem>>, vector<8x128xf32>
      %cst_163 = arith.constant dense<0.000000e+00> : vector<8xf32>
      %258 = vector.multi_reduction <add>, %257, %cst_163 [1] : vector<8x128xf32> to vector<8xf32>
      %259 = vector.shape_cast %258 : vector<8xf32> to vector<8x1xf32>
      %cst_164 = arith.constant dense<0.000000e+00> : vector<1xf32>
      %260 = vector.multi_reduction <add>, %259, %cst_164 [0] : vector<8x1xf32> to vector<1xf32>
      %261 = vector.shape_cast %260 : vector<1xf32> to vector<1x1xf32>
      %c0_165 = arith.constant 0 : index
      %c0_166 = arith.constant 0 : index
      %262 = vector.load %arg13[%c0_165, %c0_166] : memref<8x128xf32, #tpu.memory_space<vmem>>, vector<8x128xf32>
      %cst_167 = arith.constant dense<0.000000e+00> : vector<8xf32>
      %263 = vector.multi_reduction <add>, %262, %cst_167 [1] : vector<8x128xf32> to vector<8xf32>
      %264 = vector.shape_cast %263 : vector<8xf32> to vector<8x1xf32>
      %cst_168 = arith.constant dense<0.000000e+00> : vector<1xf32>
      %265 = vector.multi_reduction <add>, %264, %cst_168 [0] : vector<8x1xf32> to vector<1xf32>
      %266 = vector.shape_cast %265 : vector<1xf32> to vector<1x1xf32>
      %cst_169 = arith.constant 4.000000e+00 : f32
      %267 = vector.broadcast %cst_169 : f32 to vector<1x1xf32>
      %268 = arith.mulf %267, %266 : vector<1x1xf32>
      %cst_170 = arith.constant 1.000000e-03 : f32
      %269 = vector.broadcast %cst_170 : f32 to vector<1x1xf32>
      %270 = arith.addf %268, %269 : vector<1x1xf32>
      %271 = arith.divf %261, %270 : vector<1x1xf32>
      %c0_171 = arith.constant 0 : index
      %c0_172 = arith.constant 0 : index
      %272 = vector.load %arg10[%c0_171, %c0_172] : memref<8x128xf32, #tpu.memory_space<vmem>>, vector<8x128xf32>
      %273 = vector.broadcast %arg0 : i32 to vector<8x128xi32>
      %274 = arith.cmpi eq, %241, %273 : vector<8x128xi32>
      %cst_173 = arith.constant 0.000000e+00 : f32
      %275 = vector.shape_cast %256 : vector<1x1xf32> to vector<1x1xf32>
      %276 = vector.broadcast %275 : vector<1x1xf32> to vector<8x128xf32>
      %277 = vector.broadcast %cst_173 : f32 to vector<8x128xf32>
      %278 = arith.select %274, %276, %277 : vector<8x128xi1>, vector<8x128xf32>
      %c2_i32 = arith.constant 2 : i32
      %279 = arith.addi %c2_i32, %arg0 : i32
      %280 = vector.broadcast %279 : i32 to vector<8x128xi32>
      %281 = arith.cmpi eq, %241, %280 : vector<8x128xi32>
      %cst_174 = arith.constant 0.000000e+00 : f32
      %282 = vector.shape_cast %271 : vector<1x1xf32> to vector<1x1xf32>
      %283 = vector.broadcast %282 : vector<1x1xf32> to vector<8x128xf32>
      %284 = vector.broadcast %cst_174 : f32 to vector<8x128xf32>
      %285 = arith.select %281, %283, %284 : vector<8x128xi1>, vector<8x128xf32>
      %286 = arith.addf %278, %285 : vector<8x128xf32>
      %287 = arith.addf %272, %286 : vector<8x128xf32>
      %c0_175 = arith.constant 0 : index
      %c0_176 = arith.constant 0 : index
      %288 = vector.load %arg10[%c0_175, %c0_176] : memref<8x128xf32, #tpu.memory_space<vmem>>, vector<8x128xf32>
      tpu.vector_store %arg10[%c0_175, %c0_176], %287 {strides = array<i32>} : memref<8x128xf32, #tpu.memory_space<vmem>>, vector<8x128xf32>,
    } else {
    }
    %c1_i32 = arith.constant 1 : i32
    %245 = arith.cmpi eq, %arg0, %c1_i32 : i32
    %c3_i32_154 = arith.constant 3 : i32
    %246 = arith.cmpi eq, %arg1, %c3_i32_154 : i32
    %247 = arith.andi %245, %246 : i1
    %248 = arith.extui %247 : i1 to i32
    %c0_i32_155 = arith.constant 0 : i32
    %249 = arith.cmpi ne, %248, %c0_i32_155 : i32
    scf.if %249 {
      %c0_156 = arith.constant 0 : index
      %c0_157 = arith.constant 0 : index
      %250 = vector.load %arg16[%c0_156, %c0_157] : memref<8x128xf32, #tpu.memory_space<vmem>>, vector<8x128xf32>
      %cst_158 = arith.constant dense<0.000000e+00> : vector<8xf32>
      %251 = vector.multi_reduction <add>, %250, %cst_158 [1] : vector<8x128xf32> to vector<8xf32>
      %252 = vector.shape_cast %251 : vector<8xf32> to vector<8x1xf32>
      %cst_159 = arith.constant dense<0.000000e+00> : vector<1xf32>
      %253 = vector.multi_reduction <add>, %252, %cst_159 [0] : vector<8x1xf32> to vector<1xf32>
      %254 = vector.shape_cast %253 : vector<1xf32> to vector<1x1xf32>
      %c0_160 = arith.constant 0 : index
      %c0_161 = arith.constant 0 : index
      %255 = vector.load %arg14[%c0_160, %c0_161] : memref<8x128xf32, #tpu.memory_space<vmem>>, vector<8x128xf32>
      %cst_162 = arith.constant dense<0.000000e+00> : vector<8xf32>
      %256 = vector.multi_reduction <add>, %255, %cst_162 [1] : vector<8x128xf32> to vector<8xf32>
      %257 = vector.shape_cast %256 : vector<8xf32> to vector<8x1xf32>
      %cst_163 = arith.constant dense<0.000000e+00> : vector<1xf32>
      %258 = vector.multi_reduction <add>, %257, %cst_163 [0] : vector<8x1xf32> to vector<1xf32>
      %259 = vector.shape_cast %258 : vector<1xf32> to vector<1x1xf32>
      %c0_164 = arith.constant 0 : index
      %c0_165 = arith.constant 0 : index
      %260 = vector.load %arg15[%c0_164, %c0_165] : memref<8x128xf32, #tpu.memory_space<vmem>>, vector<8x128xf32>
      %cst_166 = arith.constant dense<0.000000e+00> : vector<8xf32>
      %261 = vector.multi_reduction <add>, %260, %cst_166 [1] : vector<8x128xf32> to vector<8xf32>
      %262 = vector.shape_cast %261 : vector<8xf32> to vector<8x1xf32>
      %cst_167 = arith.constant dense<0.000000e+00> : vector<1xf32>
      %263 = vector.multi_reduction <add>, %262, %cst_167 [0] : vector<8x1xf32> to vector<1xf32>
      %264 = vector.shape_cast %263 : vector<1xf32> to vector<1x1xf32>
      %cst_168 = arith.constant 9.99999997E-7 : f32
      %265 = vector.broadcast %cst_168 : f32 to vector<1x1xf32>
      %266 = arith.addf %259, %265 : vector<1x1xf32>
      %267 = arith.divf %254, %266 : vector<1x1xf32>
      %cst_169 = arith.constant 9.99999997E-7 : f32
      %268 = vector.broadcast %cst_169 : f32 to vector<1x1xf32>
      %269 = arith.addf %264, %268 : vector<1x1xf32>
      %270 = arith.divf %254, %269 : vector<1x1xf32>
      %c0_170 = arith.constant 0 : index
      %c0_171 = arith.constant 0 : index
      %271 = vector.load %arg10[%c0_170, %c0_171] : memref<8x128xf32, #tpu.memory_space<vmem>>, vector<8x128xf32>
      %c4_i32 = arith.constant 4 : i32
      %272 = vector.broadcast %c4_i32 : i32 to vector<8x128xi32>
      %273 = arith.cmpi eq, %241, %272 : vector<8x128xi32>
      %cst_172 = arith.constant 0.000000e+00 : f32
      %274 = vector.shape_cast %267 : vector<1x1xf32> to vector<1x1xf32>
      %275 = vector.broadcast %274 : vector<1x1xf32> to vector<8x128xf32>
      %276 = vector.broadcast %cst_172 : f32 to vector<8x128xf32>
      %277 = arith.select %273, %275, %276 : vector<8x128xi1>, vector<8x128xf32>
      %c5_i32 = arith.constant 5 : i32
      %278 = vector.broadcast %c5_i32 : i32 to vector<8x128xi32>
      %279 = arith.cmpi eq, %241, %278 : vector<8x128xi32>
      %cst_173 = arith.constant 0.000000e+00 : f32
      %280 = vector.shape_cast %270 : vector<1x1xf32> to vector<1x1xf32>
      %281 = vector.broadcast %280 : vector<1x1xf32> to vector<8x128xf32>
      %282 = vector.broadcast %cst_173 : f32 to vector<8x128xf32>
      %283 = arith.select %279, %281, %282 : vector<8x128xi1>, vector<8x128xf32>
      %284 = arith.addf %277, %283 : vector<8x128xf32>
      %285 = arith.addf %271, %284 : vector<8x128xf32>
      %c0_174 = arith.constant 0 : index
      %c0_175 = arith.constant 0 : index
      %286 = vector.load %arg10[%c0_174, %c0_175] : memref<8x128xf32, #tpu.memory_space<vmem>>, vector<8x128xf32>
      tpu.vector_store %arg10[%c0_174, %c0_175], %285 {strides = array<i32>} : memref<8x128xf32, #tpu.memory_space<vmem>>, vector<8x128xf32>,
    } else {
    }
    return
  }
  func.func @transform_0(%arg0: i32, %arg1: i32) -> (i32, i32) {
    %c0_i32 = arith.constant 0 : i32
    %c0_i32_0 = arith.constant 0 : i32
    %c0_i32_1 = arith.constant 0 : i32
    return %c0_i32, %c0_i32_0 : i32, i32
  }
  func.func @transform_1(%arg0: i32, %arg1: i32) -> i32 {
    %c0_i32 = arith.constant 0 : i32
    %c0_i32_0 = arith.constant 0 : i32
    return %c0_i32 : i32
  }
  func.func @transform_2(%arg0: i32, %arg1: i32) -> (i32, i32, i32, i32) {
    %c0_i32 = arith.constant 0 : i32
    %c0_i32_0 = arith.constant 0 : i32
    %c0_i32_1 = arith.constant 0 : i32
    return %arg0, %c0_i32, %arg1, %c0_i32_0 : i32, i32, i32, i32
  }
  func.func @transform_3(%arg0: i32, %arg1: i32) -> (i32, i32, i32) {
    %c0_i32 = arith.constant 0 : i32
    %c0_i32_0 = arith.constant 0 : i32
    return %arg0, %arg1, %c0_i32 : i32, i32, i32
  }
  func.func @transform_4(%arg0: i32, %arg1: i32) -> (i32, i32, i32, i32) {
    %c0_i32 = arith.constant 0 : i32
    %c0_i32_0 = arith.constant 0 : i32
    %c0_i32_1 = arith.constant 0 : i32
    return %arg0, %c0_i32, %arg1, %c0_i32_0 : i32, i32, i32, i32
  }
  func.func @transform_5(%arg0: i32, %arg1: i32) -> (i32, i32, i32) {
    %c0_i32 = arith.constant 0 : i32
    %c0_i32_0 = arith.constant 0 : i32
    return %arg0, %arg1, %c0_i32 : i32, i32, i32
  }
  func.func @transform_6(%arg0: i32, %arg1: i32) -> (i32, i32, i32, i32) {
    %c0_i32 = arith.constant 0 : i32
    %c0_i32_0 = arith.constant 0 : i32
    %c0_i32_1 = arith.constant 0 : i32
    return %arg0, %c0_i32, %arg1, %c0_i32_0 : i32, i32, i32, i32
  }
  func.func @transform_7(%arg0: i32, %arg1: i32) -> (i32, i32, i32, i32) {
    %c0_i32 = arith.constant 0 : i32
    %c0_i32_0 = arith.constant 0 : i32
    %c0_i32_1 = arith.constant 0 : i32
    return %arg0, %c0_i32, %arg1, %c0_i32_0 : i32, i32, i32, i32
  }
  func.func @transform_8(%arg0: i32, %arg1: i32) -> (i32, i32) {
    %c0_i32 = arith.constant 0 : i32
    %c0_i32_0 = arith.constant 0 : i32
    %c0_i32_1 = arith.constant 0 : i32
    return %c0_i32, %c0_i32_0 : i32, i32
  }
}

</mosaic_0001>

<bundles_post_ra>
// kernel: net_wrapper_forward.1
= control target key start
LH: loop header
LB: loop body
LE: loop exit
PB: predicated region body
PF: predicated region fallthrough
CT: control target
= control target key end

     0   :  { %s1829_s0 = inlined_call_operand.vmem [shape: f32[4,6], index: 0, kind: input, shape index: {}]   ;;  %s1830_s1 = inlined_call_operand.vmem [shape: f32[6], index: 1, kind: input, shape index: {}]   ;;  %s1831_s2 = inlined_call_operand.vmem [shape: f32[2,4,32,128], index: 2, kind: input, shape index: {}]   ;;  %s1832_s3 = inlined_call_operand.vmem [shape: f32[2,32,128], index: 3, kind: input, shape index: {}]   ;;  %s1833_s4 = inlined_call_operand.vmem [shape: f32[2,4,32,128], index: 4, kind: input, shape index: {}]   ;;  %s1834_s5 = inlined_call_operand.vmem [shape: f32[2,32,128], index: 5, kind: input, shape index: {}]   ;;  %s1835_s6 = inlined_call_operand.vmem [shape: f32[2,2,32,128], index: 6, kind: output, shape index: {0}]   ;;  %s1836_s7 = inlined_call_operand.vmem [shape: f32[2,4,32,128], index: 7, kind: output, shape index: {1}]   ;;  %s1837_s8 = inlined_call_operand.vmem [shape: f32[8,128], index: 8, kind: output, shape index: {2}]  }
   0x1   :  { %1839 = sst [smem:[#allocation19_spill]] %s1829_s0 }
   0x2   :  { %1840 = sst [smem:[#allocation20_spill]] %s1830_s1 }
   0x3   :  { %1841 = sst [smem:[#allocation21_spill]] %s1831_s2 }
   0x4   :  { %1842 = sst [smem:[#allocation22_spill]] %s1833_s4 }
   0x5   :  { %14 = vsyncpa [#allocation9], 0 }
   0x6   :  { %15 = vsyncpa [#allocation11], 0  ;;  %s1489_s27 = smov 0   ;;  %s1491_s28 = smov 0  }
   0x7   :  { %s1493_s29 = smov 0   ;;  %s1495_s30 = smov 0  }
   0x8   :  { %s1497_s9 = smov 0   ;;  %s1499_s10 = smov 0  }
   0x9   :  { %s1501_s11 = smov 0  }
   0xa LB: > { %s1178_s12 = sadd.s32 4294967295, %s1437_s11   ;;  %s30_s13 = sadd.s32 1, %s1429_s9  ;;  %s1437_s11 = sphi %s1501_s11, %s21_s11   ;;  %s1433_s10 = sphi %s1499_s10, %s1862_s10   ;;  %s1429_s9 = sphi %s1497_s9, %s1861_s9   ;;  %s1425_s30 = sphi %s1495_s30, %s1860_s30   ;;  %s1421_s29 = sphi %s1493_s29, %s1859_s29   ;;  %s1417_s28 = sphi %s1491_s28, %s1858_s28   ;;  %s1413_s27 = sphi %s1489_s27, %s1857_s27  }
   0xb   : > { %p31_p0 = scmp.ge.s32.totalorder %s30_s13, 4  ;;  %s33_s14 = sadd.s32 1, %s1433_s10 }
   0xc   : > { %s84_s15 = sadd.s32 1, %s1417_s28  ;;  %p91_p1 = scmp.ne.s32.totalorder %s1417_s28, %s1413_s27 }
   0xd   : > { %s1864_s13 = smov (%p31_p0, %s30_s13), 0  ;;  %s1866_s14 = smov (!%p31_p0, %s33_s14), %s1433_s10 }
   0xe   : > { %s80_s16 = ssub.s32 %s1429_s9, %s1864_s13  ;;  %p92_p2 = scmp.eq.s32.totalorder %s1437_s11, 0 }
   0xf   : > { %p35_p3 = scmp.ge.s32.totalorder %s1866_s14, 2  ;;  %p207_p4 = scmp.eq.s32.totalorder %s1178_s12, 7 }
  0x10   : > { %p1536_p5 = por %p92_p2, %p91_p1  ;;  %p1180_p6 = scmp.ge.s32.totalorder %s1437_s11, 1 }
  0x11   : > { %s1868_s14 = smov (%p35_p3, %s1866_s14), 0  ;;  %p1543_p7 = por %p207_p4, %p91_p1 }
  0x12   : > { %1844 = sst [smem:[#allocation18_spill]] %s1868_s14  ;;  %p269_p8 = scmp.lt.s32.totalorder %s1437_s11, 9 }
  0x13   : > { %s79_s19 = ssub.s32 %s1433_s10, %s1868_s14  ;;  %p1554_p11 = scmp.eq.s32.totalorder %s1178_s12, 0 }
  0x14   : > { %s81_s20 = sor.u32 %s80_s16, %s79_s19  ;;  %p1550_p9 = pnand %p1180_p6, %p269_p8 }
  0x15   : > { %p82_p10 = scmp.eq.s32.totalorder %s81_s20, 0  ;;  %s1848_s0 = sld [smem:[#allocation19_spill]] }
  0x16   : > { %p1263_p12 = pneg %p1550_p9  ;;  %s1849_s1 = sld [smem:[#allocation20_spill]] }
  0x17   : > { %s1564_s26 = scalar_select %p82_p10, %s1417_s28, %s84_s15  }
  0x18   : > { %p1264_p13 = pnand %p1554_p11, %p1263_p12  ;;  %s1439_s12 = smov [#allocation8]  }
  0x19   : > { %s1440_s14 = smov [#allocation10]   ;;  %p1183_p0 = scmp.ge.s32.totalorder %s1437_s11, 8 }
  0x1b   : > { %s281_s25 = sshll.u32 %s1848_s0, 4  ;;  %298 = sbr.rel (%p1183_p0) target bundleno = 60 (0x3c), region = 24  ;;  %s282_s25 = int_to_ptr.vmem [resolvable:$true] %s281_s25 }
  0x1c   : > { %s291_s20 = sshll.u32 %s1849_s1, 4  ;;  %s292_s20 = int_to_ptr.vmem [resolvable:$true] %s291_s20 }
  0x1d   : > { %1266 = dma.vmem_to_smem (!%p1264_p13), %s282_s25, 64, %s1439_s12, [#allocation9]  }
  0x1e   : > { %1269 = dma.vmem_to_smem (!%p1264_p13), %s292_s20, 16, %s1440_s14, [#allocation11]  }
  0x20   : > { %301 = sbr.rel (!%p1536_p5) target bundleno = 46 (0x2e), region = 28  ;;  %s303_s15 = sand.u32 (%p1536_p5), 1, %s1417_s28  }
  0x21   : > { %s1185_s23 = sshll.u32 (%p1536_p5), %s1433_s10, 4  ;;  %s1184_s24 = sshll.u32 (%p1536_p5), %s303_s15, 5 }
  0x22   : > { %s307_s0 = sadd.s32 (%p1536_p5), %s1429_s9, %s1185_s23  ;;  %s1850_s2 = sld [smem:[#allocation21_spill]] (%p1536_p5) }
  0x23   : > { %s1186_s16 = sshll.u32 (%p1536_p5), %s307_s0, 3  ;;  %s305_s14 = scalar_lea.vmem (%p1536_p5), [#allocation12], %s1184_s24 }
  0x28   : > { %s309_s25 = scalar_lea.vmem %s1850_s2, %s1186_s16 }
  0x29   : > { %v344_v0 = vld [vmem:[%s309_s25] sm:$0xff] }
  0x2a   : > { %v346_v1 = vld [vmem:[%s309_s25 + $0x20] sm:$0xff]  ;;  %345 = vst [vmem:[%s305_s14] sm:$0xff] %v344_v0 }
  0x2b   : > { %v348_v2 = vld [vmem:[%s309_s25 + $0x40] sm:$0xff]  ;;  %347 = vst [vmem:[%s305_s14 + $0x8] sm:$0xff] %v346_v1 }
  0x2c   : > { %v350_v3 = vld [vmem:[%s309_s25 + $0x60] sm:$0xff]  ;;  %349 = vst [vmem:[%s305_s14 + $0x10] sm:$0xff] %v348_v2 }
  0x2d   : > { %351 = vst [vmem:[%s305_s14 + $0x18] sm:$0xff] %v350_v3 }
  0x2e PF: > { %368 = sbr.rel (!%p1536_p5) target bundleno = 60 (0x3c), region = 70  ;;  %s370_s0 = sand.u32 (%p1536_p5), 1, %s1417_s28  }
  0x2f   : > { %s1188_s20 = sshll.u32 (%p1536_p5), %s1433_s10, 4  ;;  %s1187_s1 = sshll.u32 (%p1536_p5), %s370_s0, 5 }
  0x30   : > { %s374_s12 = sadd.s32 (%p1536_p5), %s1429_s9, %s1188_s20  ;;  %s1851_s4 = sld [smem:[#allocation22_spill]] (%p1536_p5) }
  0x31   : > { %s1189_s15 = sshll.u32 (%p1536_p5), %s374_s12, 3  ;;  %s372_s19 = scalar_lea.vmem (%p1536_p5), [#allocation13], %s1187_s1 }
  0x36   : > { %s376_s24 = scalar_lea.vmem %s1851_s4, %s1189_s15 }
  0x37   : > { %v411_v4 = vld [vmem:[%s376_s24] sm:$0xff] }
  0x38   : > { %v413_v5 = vld [vmem:[%s376_s24 + $0x20] sm:$0xff]  ;;  %412 = vst [vmem:[%s372_s19] sm:$0xff] %v411_v4 }
  0x39   : > { %v415_v6 = vld [vmem:[%s376_s24 + $0x40] sm:$0xff]  ;;  %414 = vst [vmem:[%s372_s19 + $0x8] sm:$0xff] %v413_v5 }
  0x3a   : > { %v417_v7 = vld [vmem:[%s376_s24 + $0x60] sm:$0xff]  ;;  %416 = vst [vmem:[%s372_s19 + $0x10] sm:$0xff] %v415_v6 }
  0x3b   : > { %418 = vst [vmem:[%s372_s19 + $0x18] sm:$0xff] %v417_v7 }
  0x3c PF: > { %438 = sbr.rel (%p1550_p9) target bundleno = 505 (0x1f9), region = 112 }
  0x41   : > { %1404 = dma.done.wait (%p1554_p11), [#allocation9], 64  }
  0x42   : > { %1406 = vsyncadd (%p1554_p11), [#allocation9], 4294967232 }
  0x43   : > { %1408 = dma.done.wait (%p1554_p11), [#allocation11], 16  }
  0x44   : > { %1410 = vsyncadd (%p1554_p11), [#allocation11], 4294967280  ;;  %s451_s17 = sand.u32 1, %s1413_s27  }
  0x45   : > { %s1193_s25 = sshll.u32 %s451_s17, 5 }
  0x46   : > { %s1599_s14 = scalar_lea.vmem [#allocation12], %s1193_s25  ;;  %s1601_s0 = scalar_lea.vmem [#allocation13], %s1193_s25 }
  0x47   : > { %464 = sfence }
  0x48   : > { %s1195_s21 = sshll.u32 %s451_s17, 4  ;;  %p515_p1 = scmp.lt.s32.totalorder %s1425_s30, 1 }
  0x49   : > { %p517_p2 = scmp.lt.s32.totalorder %s1421_s29, 3  ;;  %p531_p3 = scmp.eq.s32.totalorder %s1421_s29, 0 }
  0x4a   : > { %s516_s20 = scalar_select %p515_p1, %s1425_s30, 1 }
  0x4b   : > { %s518_s22 = scalar_select %p517_p2, %s1421_s29, 3 }
  0x4c   : > { %s1197_s1 = sshll.u32 %s516_s20, 2  ;;  %s1618_s2 = scalar_lea.vmem [#allocation14], %s1195_s21 }
  0x4d   : > { %s520_s12 = sadd.s32 %s1197_s1, %s518_s22  ;;  %s1620_s4 = scalar_lea.vmem [#allocation15], %s1193_s25 }
  0x4e   : > { %s1198_s27 = sshll.u32 %s520_s12, 3  ;;  %p1201_p4 = scmp.ne.s32.totalorder %s1421_s29, 0 }
  0x4f   : > { %s1611_s16 = scalar_lea.vmem %s1832_s3, %s1198_s27  ;;  %s1616_s17 = scalar_lea.vmem %s1834_s5, %s1198_s27 }
  0x50   : > { %534 = sbr.rel (%p1201_p4) target bundleno = 89 (0x59), region = 132 }
  0x55   : > { %v1441_v8 = vmov 0.0  }
  0x56   : > { %535 = vst [vmem:[#allocation2] sm:$0xff] %v1441_v8 }
  0x57   : > { %536 = vst [vmem:[#allocation3] sm:$0xff] %v1441_v8 }
  0x58   : > { %537 = vst [vmem:[#allocation4] sm:$0xff] %v1441_v8 }
  0x59 PF: > { %p538_p5 = scmp.eq.s32.totalorder %s1425_s30, 0 }
  0x5b   : > { %p539_p6 = pnand %p538_p5, %p531_p3 }
  0x5d   : > { %542 = sbr.rel (%p539_p6) target bundleno = 103 (0x67), region = 136 }
  0x62   : > { %v1442_v9 = vmov 0.0  }
  0x63   : > { %543 = vst [vmem:[#allocation5] sm:$0xff] %v1442_v9 }
  0x64   : > { %544 = vst [vmem:[#allocation6] sm:$0xff] %v1442_v9 }
  0x65   : > { %545 = vst [vmem:[#allocation7] sm:$0xff] %v1442_v9 }
  0x66   : > { %546 = vst [vmem:[%s1837_s8] sm:$0xff] %v1442_v9 }
  0x67 PF: > { %s554_s20 = sld [smem:[#allocation8]]  ;;  %p756_p8 = scmp.eq.s32.totalorder %s1421_s29, 3  ;;  %v1631_v10 = vld [vmem:[%s1599_s14] sm:$0xff]  ;;  %v1634_v11 = vld [vmem:[%s1599_s14 + $0x8] sm:$0xff]  ;;  %v1637_v13 = vld [vmem:[%s1599_s14 + $0x10] sm:$0xff]  ;;  %v1443_v61 = vmov 0.0  }
  0x68   : > { %s557_s22 = sld [smem:[#allocation10]]  ;;  %v1641_v16 = vld [vmem:[%s1599_s14 + $0x18] sm:$0xff]  ;;  %v1655_v39 = vld [vmem:[%s1611_s16] sm:$0xff]  ;;  %v741_v53 = vld [vmem:[#allocation4] sm:$0xff]  ;;  %p1246_p9 = scmp.ne.s32.totalorder %s1421_s29, 3 }
  0x69   : > { %s1205_s1 = sld [smem:[#allocation8 + $0x80]]  ;;  %vm717_vm0 = vcmp.eq.f32.partialorder %v1655_v39, 1.0  ;;  %v1679_v54 = vld [vmem:[%s1616_s17] sm:$0xff]  ;;  %v613_v63 = vld [vmem:[%s1601_s0] sm:$0xff] }
  0x6a   : > { %s1206_s12 = sld [smem:[#allocation8 + $0x100]]  ;;  %v742_v60 = vadd.f32 %v741_v53, %v1679_v54  ;;  %v1693_v62 = vsel %vm717_vm0, 1.0, %v1443_v61  ;;  %v744_v7 = vld [vmem:[#allocation5] sm:$0xff] }
  0x6b   : > { %s1207_s27 = sld [smem:[#allocation8 + $0x180]] }
  0x6c   : > { %s1208_s15 = sld [smem:[#allocation8 + $0x1]]  ;;  %743 = vst [vmem:[#allocation4] sm:$0xff] %v742_v60 }
  0x6d   : > { %v555_v12 = vstv %s554_s20  ;;  %s1209_s23 = sld [smem:[#allocation10 + $0x1]] }
  0x6e   : > { %v556_v14 = vmul.f32 %v555_v12, %v1631_v10  ;;  %v558_v15 = vstv %s557_s22  ;;  %s1210_s24 = sld [smem:[#allocation8 + $0x81]] }
  0x6f   : > { %v561_v17 = vstv %s1205_s1  ;;  %s1211_s19 = sld [smem:[#allocation8 + $0x101]] }
  0x70   : > { %v559_v18 = vadd.f32 %v558_v15, %v556_v14  ;;  %v562_v19 = vmul.f32 %v1634_v11, %v561_v17  ;;  %v565_v20 = vstv %s1206_s12  ;;  %s1212_s25 = sld [smem:[#allocation8 + $0x181]] }
  0x71   : > { %v566_v21 = vmul.f32 %v1637_v13, %v565_v20  ;;  %v569_v22 = vstv %s1207_s27  ;;  %s1214_s21 = sld [smem:[#allocation8 + $0x2]] }
  0x72   : > { %v563_v23 = vadd.f32 %v562_v19, %v559_v18  ;;  %v570_v24 = vmul.f32 %v1641_v16, %v569_v22  ;;  %v573_v25 = vstv %s1208_s15  ;;  %s1215_s20 = sld [smem:[#allocation10 + $0x2]] }
  0x73   : > { %v574_v26 = vmul.f32 %v573_v25, %v1631_v10  ;;  %v576_v27 = vstv %s1209_s23  ;;  %s1216_s14 = sld [smem:[#allocation8 + $0x82]]  ;;  %v1226_v25 = vld [vmem:[%s1601_s0 + $0x8] sm:$0xff] }
  0x74   : > { %v567_v28 = vadd.f32 %v566_v21, %v563_v23  ;;  %v579_v29 = vstv %s1210_s24  ;;  %s1217_s22 = sld [smem:[#allocation8 + $0x102]] }
  0x75   : > { %v577_v30 = vadd.f32 %v576_v27, %v574_v26  ;;  %v580_v31 = vmul.f32 %v1634_v11, %v579_v29  ;;  %v583_v32 = vstv %s1211_s19  ;;  %s1218_s1 = sld [smem:[#allocation8 + $0x182]]  ;;  %v747_v29 = vld [vmem:[#allocation6] sm:$0xff] }
  0x76   : > { %v1648_v33 = vadd.f32 %v570_v24, %v567_v28  ;;  %v584_v34 = vmul.f32 %v1637_v13, %v583_v32  ;;  %v587_v35 = vstv %s1212_s25  ;;  %s1220_s12 = sld [smem:[#allocation8 + $0x3]] }
  0x77   : > { %v581_v36 = vadd.f32 %v580_v31, %v577_v30  ;;  %v588_v37 = vmul.f32 %v1641_v16, %v587_v35  ;;  %v595_v38 = vstv %s1214_s21  ;;  %s1652_s27 = sld [smem:[#allocation10 + $0x3]] }
  0x78   : > { %590 = vst [vmem:[%s1618_s2] sm:$0xff] %v1648_v33  ;;  %v596_v40 = vmul.f32 %v595_v38, %v1631_v10  ;;  %v598_v41 = vstv %s1215_s20  ;;  %s1660_s15 = sld [smem:[#allocation8 + $0x83]] }
  0x79   : > { %v585_v42 = vadd.f32 %v584_v34, %v581_v36  ;;  %v601_v43 = vstv %s1216_s14  ;;  %s1662_s23 = sld [smem:[#allocation8 + $0x103]] }
  0x7a   : > { %v599_v44 = vadd.f32 %v598_v41, %v596_v40  ;;  %v602_v45 = vmul.f32 %v1634_v11, %v601_v43  ;;  %v605_v46 = vstv %s1217_s22  ;;  %s1665_s16 = sld [smem:[#allocation8 + $0x183]] }
  0x7b   : > { %v1668_v47 = vadd.f32 %v588_v37, %v585_v42  ;;  %v606_v48 = vmul.f32 %v1637_v13, %v605_v46  ;;  %v609_v49 = vstv %s1218_s1  ;;  %s1671_s24 = sld [smem:[#allocation8 + $0x4]]  ;;  %v748_v42 = vadd.f32 %v1693_v62, %v747_v29 }
  0x7c   : > { %v603_v50 = vadd.f32 %v602_v45, %v599_v44  ;;  %v610_v51 = vmul.f32 %v1641_v16, %v609_v49  ;;  %v624_v52 = vstv %s1220_s12  ;;  %s1674_s19 = sld [smem:[#allocation10 + $0x4]]  ;;  %v1234_v49 = vld [vmem:[%s1601_s0 + $0x10] sm:$0xff] }
  0x7d   : > { %1213 = vst [vmem:[%s1618_s2 + $0x8] sm:$0xff] %v1668_v47  ;;  %v625_v55 = vmul.f32 %v624_v52, %v1631_v10  ;;  %v627_v56 = vstv %s1652_s27  ;;  %s1683_s25 = sld [smem:[#allocation8 + $0x84]]  ;;  %v724_v57 = vsub.f32 %v1668_v47, %v1648_v33  ;;  %vm720_vm1 = vcmp.gt.f32.partialorder %v1668_v47, %v1648_v33 }
  0x7e   : > { %v607_v58 = vadd.f32 %v606_v48, %v603_v50  ;;  %v630_v59 = vstv %s1660_s15  ;;  %s1688_s21 = sld [smem:[#allocation8 + $0x104]]  ;;  %v1245_v19 = vsel %vm720_vm1, 1.0, %v1443_v61  ;;  %749 = vst [vmem:[#allocation6] sm:$0xff] %v748_v42 }
  0x7f   : > { %v628_v0 = vadd.f32 %v627_v56, %v625_v55  ;;  %v631_v1 = vmul.f32 %v1634_v11, %v630_v59  ;;  %v634_v2 = vstv %s1662_s23  ;;  %s1698_s17 = sld [smem:[#allocation8 + $0x184]]  ;;  %v725_v3 = vand.u32 2147483647, %v724_v57 }
  0x80   : > { %v611_v4 = vadd.f32 %v610_v51, %v607_v58  ;;  %v635_v5 = vmul.f32 %v1637_v13, %v634_v2  ;;  %v638_v6 = vstv %s1665_s16  ;;  %s1702_s20 = sld [smem:[#allocation8 + $0x5]]  ;;  %v745_v23 = vadd.f32 %v1245_v19, %v744_v7  ;;  %v750_v2 = vld [vmem:[#allocation7] sm:$0xff] }
  0x81   : > { %v632_v8 = vadd.f32 %v631_v1, %v628_v0  ;;  %v639_v9 = vmul.f32 %v1641_v16, %v638_v6  ;;  %v655_v12 = vstv %s1671_s24  ;;  %s1708_s14 = sld [smem:[#allocation10 + $0x5]]  ;;  %v726_v14 = vsub.f32 0.0, %v725_v3 }
  0x82   : > { %612 = vst [vmem:[%s1620_s4] sm:$0xff] %v611_v4  ;;  %v614_v15 = vsub.f32 %v611_v4, %v613_v63  ;;  %v656_v17 = vmul.f32 %v655_v12, %v1631_v10  ;;  %v658_v18 = vstv %s1674_s19  ;;  %s1713_s22 = sld [smem:[#allocation8 + $0x85]]  ;;  %v751_v4 = vmul.f32 %v1245_v19, %v1693_v62 }
  0x83   : > { %v636_v20 = vadd.f32 %v635_v5, %v632_v8  ;;  %v661_v21 = vstv %s1683_s25  ;;  %s1716_s1 = sld [smem:[#allocation8 + $0x105]]  ;;  %v727_v22 = vmul.f32 1.442695, %v726_v14  ;;  %746 = vst [vmem:[#allocation5] sm:$0xff] %v745_v23  ;;  %v754_v7 = vlaneseq  ;;  %v1242_v8 = vld [vmem:[%s1601_s0 + $0x18] sm:$0xff]  ;;  %s809_s0 = sadd.s32 (!%p1246_p9), 2, %s1425_s30 }
  0x84   : > { %v615_v24 = vmul.f32 %v614_v15, %v1679_v54  ;;  %v659_v26 = vadd.f32 %v658_v18, %v656_v17  ;;  %v662_v27 = vmul.f32 %v1634_v11, %v661_v21  ;;  %v665_v28 = vstv %s1688_s21  ;;  %s1722_s12 = sld [smem:[#allocation8 + $0x185]] }
  0x85   : > { %v640_v30 = vadd.f32 %v639_v9, %v636_v20  ;;  %v666_v31 = vmul.f32 %v1637_v13, %v665_v28  ;;  %v669_v32 = vstv %s1698_s17  ;;  %1335 = vpow2.f32 %v727_v22 }
  0x86   : > { %v616_v34 = vand.u32 2147483647, %v615_v24  ;;  %v618_v35 = vmul.f32 0.5, %v615_v24  ;;  %v663_v36 = vadd.f32 %v662_v27, %v659_v26  ;;  %v670_v37 = vmul.f32 %v1641_v16, %v669_v32  ;;  %v735_v32 = vld [vmem:[#allocation2] sm:$0xff] }
  0x87   : > { %1225 = vst [vmem:[%s1620_s4 + $0x8] sm:$0xff] %v640_v30  ;;  %v645_v38 = vsub.f32 %v640_v30, %v1226_v25  ;;  %v686_v40 = vstv %s1702_s20  ;;  %v689_v41 = vstv %s1708_s14  ;;  %v752_v9 = vadd.f32 %v751_v4, %v750_v2 }
  0x88   : > { %v619_v43 = vmul.f32 %v618_v35, %v615_v24  ;;  %v667_v44 = vadd.f32 %v666_v31, %v663_v36  ;;  %v687_v45 = vmul.f32 %v686_v40, %v1631_v10  ;;  %v1219_v46 = vadd.f32 -0.5, %v616_v34 }
  0x89   : > { %v646_v48 = vmul.f32 %v645_v38, %v1679_v54  ;;  %v692_v50 = vstv %s1713_s22  ;;  %v696_v51 = vstv %s1716_s1  ;;  %vm1739_vm2 = vcmp.lt.f32.partialorder %v616_v34, 1.0  ;;  %753 = vst [vmem:[#allocation7] sm:$0xff] %v752_v9  ;;  %v738_v38 = vld [vmem:[#allocation3] sm:$0xff] }
  0x8a   : > { %v671_v52 = vadd.f32 %v670_v37, %v667_v44  ;;  %v690_v53 = vadd.f32 %v689_v41, %v687_v45  ;;  %v693_v55 = vmul.f32 %v1634_v11, %v692_v50  ;;  %v697_v56 = vmul.f32 %v1637_v13, %v696_v51 }
  0x8b   : > { %v1336_v57 = vpop.eup %1335  ;;  %v647_v58 = vand.u32 2147483647, %v646_v48  ;;  %v649_v59 = vmul.f32 0.5, %v646_v48  ;;  %v700_v60 = vstv %s1722_s12  ;;  %v1756_v18 = vshrl.u32 %v754_v7, 7 }
  0x8c   : > { %1233 = vst [vmem:[%s1620_s4 + $0x10] sm:$0xff] %v671_v52  ;;  %v676_v61 = vsub.f32 %v671_v52, %v1234_v49  ;;  %v694_v63 = vadd.f32 %v693_v55, %v690_v53  ;;  %v701_v0 = vmul.f32 %v1641_v16, %v700_v60  ;;  %v729_v1 = vadd.f32 1.0, %v1336_v57 }
  0x8d   : > { %v650_v3 = vmul.f32 %v649_v59, %v646_v48  ;;  %v1227_v11 = vadd.f32 -0.5, %v647_v58  ;;  %vm1745_vm3 = vcmp.lt.f32.partialorder %v647_v58, 1.0  ;;  %v621_v16 = vsel %vm1739_vm2, %v619_v43, %v1219_v46 }
  0x8e   : > { %v677_v5 = vmul.f32 %v676_v61, %v1679_v54  ;;  %v698_v6 = vadd.f32 %v697_v56, %v694_v63  ;;  %1337 = vlog2.f32 %v729_v1  ;;  %v723_v21 = vmax.f32 %v1648_v33, %v1668_v47 }
  0x8f   : > { %v652_v17 = vsel %vm1745_vm3, %v650_v3, %v1227_v11  ;;  %v733_v28 = vsel %vm717_vm0, %v1668_v47, %v1648_v33 }
  0x90   : > { %v678_v12 = vand.u32 2147483647, %v677_v5  ;;  %v680_v14 = vmul.f32 0.5, %v677_v5  ;;  %v702_v15 = vadd.f32 %v701_v0, %v698_v6  ;;  %v653_v22 = vadd.f32 %v652_v17, %v621_v16 }
  0x92   : > { %v681_v62 = vmul.f32 %v680_v14, %v677_v5  ;;  %1241 = vst [vmem:[%s1620_s4 + $0x18] sm:$0xff] %v702_v15  ;;  %v707_v19 = vsub.f32 %v702_v15, %v1242_v8  ;;  %vm679_vm4 = vcmp.lt.f32.partialorder %v678_v12, 1.0  ;;  %v1235_v20 = vadd.f32 -0.5, %v678_v12 }
  0x94   : > { %v1338_v23 = vpop.eup %1337  ;;  %v708_v24 = vmul.f32 %v707_v19, %v1679_v54  ;;  %v683_v25 = vsel %vm679_vm4, %v681_v62, %v1235_v20 }
  0x95   : > { %v731_v26 = vmul.f32 0.6931472, %v1338_v23  ;;  %v684_v31 = vadd.f32 %v683_v25, %v653_v22 }
  0x96   : > { %v711_v27 = vmul.f32 0.5, %v708_v24  ;;  %v709_v29 = vand.u32 2147483647, %v708_v24 }
  0x97   : > { %v732_v30 = vadd.f32 %v731_v26, %v723_v21 }
  0x98   : > { %vm710_vm5 = vcmp.lt.f32.partialorder %v709_v29, 1.0  ;;  %v712_v34 = vmul.f32 %v711_v27, %v708_v24  ;;  %v1243_v35 = vadd.f32 -0.5, %v709_v29 }
  0x99   : > { %v734_v36 = vsub.f32 %v732_v30, %v733_v28 }
  0x9a   : > { %v714_v37 = vsel %vm710_vm5, %v712_v34, %v1243_v35 }
  0x9b   : > { %v736_v40 = vadd.f32 %v735_v32, %v734_v36  ;;  %v715_v54 = vadd.f32 %v714_v37, %v684_v31  ;;  %759 = sbr.rel (%p1246_p9) target bundleno = 318 (0x13e), region = 140 }
  0x9d   : > { %737 = vst [vmem:[#allocation2] sm:$0xff] %v736_v40  ;;  %v739_v41 = vadd.f32 %v738_v38, %v715_v54 }
  0x9f   : > { %740 = vst [vmem:[#allocation3] sm:$0xff] %v739_v41 }
  0xa0   : > { %v779_v39 = vld [vmem:[#allocation4] sm:$0xff]  ;;  %v810_v7 = vstv %s809_s0  ;;  %v806_v8 = vstv %s1425_s30  ;;  %v805_v19 = vld [vmem:[%s1837_s8] sm:$0xff] }
  0xa1   : > { %780 = vadd.xlane.f32.xlu0 %v779_v39  ;;  %vm811_vm10 = vcmp.eq.s32.totalorder %v1756_v18, %v810_v7  ;;  %vm807_vm11 = vcmp.eq.s32.totalorder %v1756_v18, %v806_v8 }
  0xa4   : > { %v760_v47 = vld [vmem:[#allocation2] sm:$0xff] }
  0xa6   : > { %v770_v33 = vld [vmem:[#allocation3] sm:$0xff] }
  0xa7   : > { %771 = vadd.xlane.f32.xlu1 %v770_v33 }
  0xa9   : > { %761 = vadd.xlane.f32.xlu0 %v760_v47 }
 0x114   : > { %v781_v42 = vpop.xlane.xlu0 %780 }
 0x115   : > { %v782_v43 = vrot.slane %v781_v42, 4 }
 0x117   : > { %v783_v44 = vadd.f32 %v782_v43, %v781_v42 }
 0x119   : > { %v784_v45 = vrot.slane %v783_v44, 2 }
 0x11a   : > { %v772_v48 = vpop.xlane.xlu1 %771 }
 0x11b   : > { %v785_v46 = vadd.f32 %v784_v45, %v783_v44  ;;  %v773_v53 = vrot.slane %v772_v48, 4 }
 0x11c   : > { %v762_v49 = vpop.xlane.xlu0 %761 }
 0x11d   : > { %v786_v50 = vrot.slane %v785_v46, 1  ;;  %v763_v51 = vrot.slane %v762_v49, 4  ;;  %v774_v58 = vadd.f32 %v773_v53, %v772_v48 }
 0x11f   : > { %v787_v52 = vadd.f32 %v786_v50, %v785_v46  ;;  %v764_v55 = vadd.f32 %v763_v51, %v762_v49  ;;  %v775_v60 = vrot.slane %v774_v58, 2 }
 0x121   : > { %v788_v56 = vmul.f32 4.0, %v787_v52  ;;  %v765_v59 = vrot.slane %v764_v55, 2  ;;  %v776_v63 = vadd.f32 %v775_v60, %v774_v58 }
 0x123   : > { %v789_v57 = vadd.f32 0.001, %v788_v56  ;;  %v766_v10 = vadd.f32 %v765_v59, %v764_v55  ;;  %v777_v11 = vrot.slane %v776_v63, 1 }
 0x125   : > { %1339 = vrcp.f32 %v789_v57  ;;  %v767_v1 = vrot.slane %v766_v10, 1  ;;  %v801_v3 = vand.u32 2147483648, %v789_v57  ;;  %v799_v4 = vand.u32 2147483647, %v789_v57 }
 0x126   : > { %vm795_vm7 = vweird.f32 %v789_v57  ;;  %v778_v12 = vadd.f32 %v777_v11, %v776_v63 }
 0x127   : > { %v768_v5 = vadd.f32 %v767_v1, %v766_v10  ;;  %v802_v16 = vor.u32 1.1754944e-38, %v801_v3  ;;  %vm800_vm9 = vcmp.eq.f32.partialorder %v799_v4, 8.507059e+37 }
 0x129   : > { %v769_v14 = vmul.f32 0.00024414063, %v768_v5 }
 0x12b   : > { %v1340_v61 = vpop.eup %1339  ;;  %v808_v20 = vsel %vm807_vm11, %v769_v14, 0.0 }
 0x12c   : > { %v791_v0 = vmul.f32 %v1340_v61, %v789_v57  ;;  %vm796_vm6 = vweird.f32 %v1340_v61 }
 0x12d   : > { %vm797_vm8 = vmor %vm795_vm7, %vm796_vm6 }
 0x12e   : > { %v792_v2 = vsub.f32 1.0, %v791_v0 }
 0x130   : > { %v793_v13 = vmul.f32 %v1340_v61, %v792_v2 }
 0x132   : > { %v794_v6 = vadd.f32 %v1340_v61, %v793_v13 }
 0x134   : > { %v798_v9 = vsel %vm797_vm8, %v1340_v61, %v794_v6 }
 0x135   : > { %v803_v15 = vsel %vm800_vm9, %v802_v16, %v798_v9 }
 0x136   : > { %v804_v17 = vmul.f32 %v803_v15, %v778_v12 }
 0x138   : > { %v812_v62 = vsel %vm811_vm10, %v804_v17, 0.0 }
 0x139   : > { %v813_v21 = vadd.f32 %v812_v62, %v808_v20 }
 0x13b   : > { %v814_v22 = vadd.f32 %v813_v21, %v805_v19 }
 0x13d   : > { %815 = vst [vmem:[%s1837_s8] sm:$0xff] %v814_v22 }
 0x13e PF: > { %p816_p10 = scmp.eq.s32.totalorder %s1425_s30, 1 }
 0x140   : > { %p817_p11 = pnand %p816_p10, %p756_p8 }
 0x142   : > { %820 = sbr.rel (%p817_p11) target bundleno = 491 (0x1eb), region = 144 }
 0x147   : > { %v830_v23 = vld [vmem:[#allocation5] sm:$0xff]  ;;  %v821_v24 = vld [vmem:[#allocation7] sm:$0xff]  ;;  %v839_v25 = vld [vmem:[#allocation6] sm:$0xff]  ;;  %vm881_vm4 = vcmp.eq.s32.totalorder %v1756_v18, 4  ;;  %vm883_vm5 = vcmp.eq.s32.totalorder %v1756_v18, 5 }
 0x148   : > { %831 = vadd.xlane.f32.xlu0 %v830_v23  ;;  %822 = vadd.xlane.f32.xlu1 %v821_v24  ;;  %v880_v5 = vld [vmem:[%s1837_s8] sm:$0xff] }
 0x150   : > { %840 = vadd.xlane.f32.xlu0 %v839_v25 }
 0x1bb   : > { %v832_v26 = vpop.xlane.xlu0 %831  ;;  %v823_v35 = vpop.xlane.xlu1 %822 }
 0x1bc   : > { %v833_v27 = vrot.slane %v832_v26, 4  ;;  %v824_v54 = vrot.slane %v823_v35, 4 }
 0x1be   : > { %v834_v28 = vadd.f32 %v833_v27, %v832_v26  ;;  %v825_v33 = vadd.f32 %v824_v54, %v823_v35 }
 0x1c0   : > { %v835_v29 = vrot.slane %v834_v28, 2  ;;  %v826_v44 = vrot.slane %v825_v33, 2 }
 0x1c2   : > { %v836_v30 = vadd.f32 %v835_v29, %v834_v28  ;;  %v827_v48 = vadd.f32 %v826_v44, %v825_v33 }
 0x1c3   : > { %v841_v31 = vpop.xlane.xlu0 %840 }
 0x1c4   : > { %v837_v32 = vrot.slane %v836_v30, 1  ;;  %v842_v34 = vrot.slane %v841_v31, 4  ;;  %v828_v53 = vrot.slane %v827_v48, 1 }
 0x1c6   : > { %v838_v36 = vadd.f32 %v837_v32, %v836_v30  ;;  %v843_v37 = vadd.f32 %v842_v34, %v841_v31  ;;  %v829_v10 = vadd.f32 %v828_v53, %v827_v48 }
 0x1c8   : > { %v848_v38 = vadd.f32 1e-06, %v838_v36  ;;  %v844_v40 = vrot.slane %v843_v37, 2 }
 0x1ca   : > { %1341 = vrcp.f32 %v848_v38  ;;  %v845_v41 = vadd.f32 %v844_v40, %v843_v37  ;;  %v860_v52 = vand.u32 2147483648, %v848_v38  ;;  %vm854_vm13 = vweird.f32 %v848_v38 }
 0x1cb   : > { %v858_v56 = vand.u32 2147483647, %v848_v38 }
 0x1cc   : > { %v846_v39 = vrot.slane %v845_v41, 1  ;;  %v861_v59 = vor.u32 1.1754944e-38, %v860_v52 }
 0x1cd   : > { %vm859_vm15 = vcmp.eq.f32.partialorder %v858_v56, 8.507059e+37 }
 0x1ce   : > { %v847_v47 = vadd.f32 %v846_v39, %v845_v41 }
 0x1d0   : > { %v1342_v42 = vpop.eup %1341  ;;  %v864_v43 = vadd.f32 1e-06, %v847_v47 }
 0x1d1   : > { %v850_v45 = vmul.f32 %v1342_v42, %v848_v38  ;;  %vm855_vm12 = vweird.f32 %v1342_v42 }
 0x1d2   : > { %1343 = vrcp.f32 %v864_v43  ;;  %vm856_vm14 = vmor %vm854_vm13, %vm855_vm12  ;;  %v876_v60 = vand.u32 2147483648, %v864_v43  ;;  %v874_v63 = vand.u32 2147483647, %v864_v43  ;;  %vm870_vm1 = vweird.f32 %v864_v43 }
 0x1d3   : > { %v851_v46 = vsub.f32 1.0, %v850_v45 }
 0x1d4   : > { %v877_v2 = vor.u32 1.1754944e-38, %v876_v60  ;;  %vm875_vm3 = vcmp.eq.f32.partialorder %v874_v63, 8.507059e+37 }
 0x1d5   : > { %v852_v49 = vmul.f32 %v1342_v42, %v851_v46 }
 0x1d7   : > { %v853_v50 = vadd.f32 %v1342_v42, %v852_v49 }
 0x1d8   : > { %v1344_v51 = vpop.eup %1343 }
 0x1d9   : > { %v866_v55 = vmul.f32 %v1344_v51, %v864_v43  ;;  %v857_v58 = vsel %vm856_vm14, %v1342_v42, %v853_v50  ;;  %vm871_vm0 = vweird.f32 %v1344_v51 }
 0x1da   : > { %v862_v0 = vsel %vm859_vm15, %v861_v59, %v857_v58  ;;  %vm872_vm2 = vmor %vm870_vm1, %vm871_vm0 }
 0x1db   : > { %v867_v57 = vsub.f32 1.0, %v866_v55  ;;  %v863_v11 = vmul.f32 %v862_v0, %v829_v10 }
 0x1dd   : > { %v868_v61 = vmul.f32 %v1344_v51, %v867_v57  ;;  %v882_v6 = vsel %vm881_vm4, %v863_v11, 0.0 }
 0x1df   : > { %v869_v1 = vadd.f32 %v1344_v51, %v868_v61 }
 0x1e1   : > { %v873_v3 = vsel %vm872_vm2, %v1344_v51, %v869_v1 }
 0x1e2   : > { %v878_v13 = vsel %vm875_vm3, %v877_v2, %v873_v3 }
 0x1e3   : > { %v879_v4 = vmul.f32 %v878_v13, %v829_v10 }
 0x1e5   : > { %v884_v7 = vsel %vm883_vm5, %v879_v4, 0.0 }
 0x1e6   : > { %v885_v8 = vadd.f32 %v884_v7, %v882_v6 }
 0x1e8   : > { %v886_v16 = vadd.f32 %v885_v8, %v880_v5 }
 0x1ea   : > { %887 = vst [vmem:[%s1837_s8] sm:$0xff] %v886_v16 }
 0x1eb PF: > { %898 = sbr.rel (!%p1543_p7) target bundleno = 497 (0x1f1), region = 148  ;;  %s1249_s17 = sshll.u32 (%p1543_p7), %s1425_s30, 3  ;;  %v933_v18 = vld [vmem:[%s1618_s2] sm:$0xff] (%p1543_p7)  ;;  %v935_v9 = vld [vmem:[%s1618_s2 + $0x8] sm:$0xff] (%p1543_p7) }
 0x1ec   : > { %s900_s20 = sadd.s32 (%p1543_p7), %s1421_s29, %s1249_s17 }
 0x1ed   : > { %s1250_s14 = sshll.u32 (%p1543_p7), %s900_s20, 3 }
 0x1ee   : > { %s902_s12 = scalar_lea.vmem (%p1543_p7), %s1835_s6, %s1250_s14 }
 0x1ef   : > { %934 = vst [vmem:[%s902_s12] sm:$0xff] (%p1543_p7), %v933_v18 }
 0x1f0   : > { %936 = vst [vmem:[%s902_s12 + $0x20] sm:$0xff] %v935_v9 }
 0x1f1 PF: > { %942 = sbr.rel (!%p1543_p7) target bundleno = 505 (0x1f9), region = 186  ;;  %s1251_s0 = sshll.u32 (%p1543_p7), %s1425_s30, 4  ;;  %v981_v12 = vld [vmem:[%s1620_s4] sm:$0xff] (%p1543_p7)  ;;  %v983_v14 = vld [vmem:[%s1620_s4 + $0x8] sm:$0xff] (%p1543_p7)  ;;  %v985_v15 = vld [vmem:[%s1620_s4 + $0x10] sm:$0xff] (%p1543_p7) }
 0x1f2   : > { %s944_s27 = sadd.s32 (%p1543_p7), %s1421_s29, %s1251_s0  ;;  %v987_v17 = vld [vmem:[%s1620_s4 + $0x18] sm:$0xff] (%p1543_p7) }
 0x1f3   : > { %s1252_s2 = sshll.u32 (%p1543_p7), %s944_s27, 3 }
 0x1f4   : > { %s946_s16 = scalar_lea.vmem (%p1543_p7), %s1836_s7, %s1252_s2 }
 0x1f5   : > { %982 = vst [vmem:[%s946_s16] sm:$0xff] (%p1543_p7), %v981_v12 }
 0x1f6   : > { %984 = vst [vmem:[%s946_s16 + $0x20] sm:$0xff] %v983_v14 }
 0x1f7   : > { %986 = vst [vmem:[%s946_s16 + $0x40] sm:$0xff] %v985_v15 }
 0x1f8   : > { %988 = vst [vmem:[%s946_s16 + $0x60] sm:$0xff] %v987_v17 }
 0x1f9 PF: > { %s21_s11 = sadd.s32 1, %s1437_s11   ;;  %s1856_s18 = sld [smem:[#allocation18_spill]] }
 0x1fa   : > { %p18_p7 = scmp.ge.s32.totalorder %s21_s11, 10   ;;  %s1857_s27 = smov %s1417_s28 }
 0x1fb   : > { %s1858_s28 = smov %s1564_s26  ;;  %s1859_s29 = smov %s1429_s9 }
 0x1fc   : > { %s1860_s30 = smov %s1433_s10  ;;  %s1861_s9 = smov %s1864_s13 }
 0x1fd   :  { %20 = sbr.rel (!%p18_p7) target bundleno = 10 (0xa), region = 300 }
 0x1ff   : > { %s1862_s10 = smov %s1856_s18 }
 0x202   :  { %1017 = vsyncpa [#allocation9], 1 }
 0x203   :  { %1019 = vsyncpa [#allocation9 + $0x1], 1 }
 0x204   :  { %1020 = vsyncpa [#allocation11], 1 }

</bundles_post_ra>
